<compile_context>
chip_gen: v7x
topology: tpu7x:2x2x1
jax: 0.10.0
libtpu: 0.0.40
codegen_flags: <defaults>
</compile_context>

<pallas_src>
import jax
import jax.numpy as jnp
from jax import lax
from jax.experimental import pallas as pl

# ---------------- model dims (small, consistent with the forward) -----------
B = 2          # batch
C = 4          # channels
H = W = 16     # spatial
P = 4          # patch size
N = (H // P) * (W // P)     # 16 patches per image (sequence length)
BN = B * N                  # 32 tokens in the fused slab
PD = C * P * P              # 64 patch dim
D = 32                      # vision hidden size
MLP = 4 * D                 # 128 transformer MLP dim
H1, H2 = 64, 32             # classifier hidden_dims
NUM_CLASSES = 5             # num_classes
LANE = 128                  # lane-aligned pad width

N_SHIFT = N.bit_length() - 1
assert (1 << N_SHIFT) == N, "in-kernel image-id uses a shift; N must be a power of 2"

LN_EPS = 1e-6
BN_EPS = 1e-5
_INV_SQRT2 = 0.7071067811865476

# ---- packed-slab row offsets ------------------------------------------------
# encoder weight slab (bf16, D lanes); all offsets are multiples of 16 (bf16 tile)
WE_PE = 0                 # (PD, D)
WE_Q = WE_PE + PD         # 64   (scale folded)
WE_K = WE_Q + D           # 96
WE_V = WE_K + D           # 128
WE_O = WE_V + D           # 160
WE_M2 = WE_O + D          # 192  (MLP, D)
WE_ROWS = WE_M2 + MLP     # 320

# misc slab (f32, D lanes)
MS_POS = 0                # (BN, D) pos + b_pe, tiled over batch
MS_LN1G = BN              # 32 (8-aligned)
MS_LN1B = BN + 1
MS_BQ = BN + 2            # scale folded
MS_BK = BN + 3
MS_BV = BN + 4
MS_BO = BN + 5
MS_LN2G = BN + 6
MS_LN2B = BN + 7
MS_BM2 = BN + 8
MS_ROWS = BN + 9          # 41

# head slab (f32, LANE lanes); multi-row sections 8-aligned
HD_WC1 = 0                # (D, LANE)   lanes [0, H1) valid  (BN1 folded)
HD_BC1 = HD_WC1 + D       # 32
HD_BC2 = HD_BC1 + 1       # 33
HD_BOUT = HD_BC2 + 1      # 34
HD_BM1 = HD_BOUT + 1      # 35
HD_WC2 = 40               # (H1, LANE)  lanes [0, H2) valid  (BN2 folded)
HD_WOUT = HD_WC2 + H1     # 104         lanes [0, NUM_CLASSES) valid
HD_ROWS = HD_WOUT + H2    # 136


def _layernorm(z, g, b):
    mu = jnp.mean(z, axis=-1, keepdims=True)
    var = jnp.mean((z - mu) ** 2, axis=-1, keepdims=True)
    return (z - mu) * lax.rsqrt(var + LN_EPS) * g + b


def _erf(x):
    # erf via the Numerical Recipes erfc approximation (|err| < 1.2e-7), built
    # from exp/mul/add/select + an EUP reciprocal so it lowers cleanly in
    # Mosaic and keeps the VALU slot light.
    a = jnp.abs(x)
    t = pl.reciprocal(1.0 + 0.5 * a, approx=True)          # EUP slot
    poly = -1.26551223 + t * (1.00002368 + t * (0.37409196 + t * (0.09678418 +
           t * (-0.18628806 + t * (0.27886807 + t * (-1.13520398 + t * (1.48851587 +
           t * (-0.82215223 + t * 0.17087277))))))))
    erfc_a = t * jnp.exp(-a * a + poly)
    erf_a = 1.0 - erfc_a
    return jnp.where(x >= 0.0, erf_a, -erf_a)


def _gelu(x):
    # exact (erf-based) GELU: matches torch.nn.GELU() default
    return 0.5 * x * (1.0 + _erf(x * _INV_SQRT2))


def _forward_kernel(patches_ref, wenc_ref, misc_ref, wm1_ref, head_ref, out_ref):
    f32 = jnp.float32
    bf16 = jnp.bfloat16

    # ---- patch embedding + positional embedding (b_pe folded into pos) ----
    x = patches_ref[...]                                               # (BN, PD) bf16
    h = (jnp.dot(x, wenc_ref[WE_PE:WE_PE + PD, :], preferred_element_type=f32)
         + misc_ref[MS_POS:MS_POS + BN, :])

    # ---- transformer block (pre-LN, single-head self-attention); the whole
    #      batch is fused, cross-image attention removed via an iota mask ----
    y = _layernorm(h, misc_ref[MS_LN1G:MS_LN1G + 1, :],
                   misc_ref[MS_LN1B:MS_LN1B + 1, :]).astype(bf16)
    q = (jnp.dot(y, wenc_ref[WE_Q:WE_Q + D, :], preferred_element_type=f32)
         + misc_ref[MS_BQ:MS_BQ + 1, :])                               # scale pre-folded
    k = (jnp.dot(y, wenc_ref[WE_K:WE_K + D, :], preferred_element_type=f32)
         + misc_ref[MS_BK:MS_BK + 1, :])
    v = (jnp.dot(y, wenc_ref[WE_V:WE_V + D, :], preferred_element_type=f32)
         + misc_ref[MS_BV:MS_BV + 1, :])

    scores = lax.dot_general(
        q.astype(bf16), k.astype(bf16),
        dimension_numbers=(((1,), (1,)), ((), ())),                    # q @ k^T, no transpose
        preferred_element_type=f32)
    r_img = jnp.right_shift(lax.broadcasted_iota(jnp.int32, (BN, BN), 0), N_SHIFT)
    c_img = jnp.right_shift(lax.broadcasted_iota(jnp.int32, (BN, BN), 1), N_SHIFT)
    scores = jnp.where(r_img == c_img, scores, -1e30)                  # block-diag mask (f32 acc)
    scores = scores - jnp.max(scores, axis=-1, keepdims=True)
    p = jnp.exp(scores)
    attn = p / jnp.sum(p, axis=-1, keepdims=True)                      # exact divide (parity)
    ao = jnp.dot(attn.astype(bf16), v.astype(bf16), preferred_element_type=f32)
    h = (h + jnp.dot(ao.astype(bf16), wenc_ref[WE_O:WE_O + D, :],
                     preferred_element_type=f32)
         + misc_ref[MS_BO:MS_BO + 1, :])

    y2 = _layernorm(h, misc_ref[MS_LN2G:MS_LN2G + 1, :],
                    misc_ref[MS_LN2B:MS_LN2B + 1, :]).astype(bf16)
    m = _gelu(jnp.dot(y2, wm1_ref[...], preferred_element_type=f32)
              + head_ref[HD_BM1:HD_BM1 + 1, :])
    m = (jnp.dot(m.astype(bf16), wenc_ref[WE_M2:WE_M2 + MLP, :],
                 preferred_element_type=f32)
         + misc_ref[MS_BM2:MS_BM2 + 1, :])
    h = h + m                                                          # (BN, D) f32

    # ---- image_embeds.mean(dim=1): per-image pooling matrix built in-kernel ----
    prow = lax.broadcasted_iota(jnp.int32, (B, BN), 0)
    pcol = jnp.right_shift(lax.broadcasted_iota(jnp.int32, (B, BN), 1), N_SHIFT)
    pool = jnp.where(prow == pcol, jnp.float32(1.0 / N), jnp.float32(0.0))
    pooled = jnp.dot(pool, h, preferred_element_type=f32)              # (B, D)

    # ---- classification head: (Linear+BN folded) -> GELU -> ... -> Linear (f32) ----
    z = _gelu(jnp.dot(pooled, head_ref[HD_WC1:HD_WC1 + D, :],
                      preferred_element_type=f32)
              + head_ref[HD_BC1:HD_BC1 + 1, :])
    z = _gelu(jnp.dot(z[:, :H1], head_ref[HD_WC2:HD_WC2 + H1, :],
                      preferred_element_type=f32)
              + head_ref[HD_BC2:HD_BC2 + 1, :])
    logits = (jnp.dot(z[:, :H2], head_ref[HD_WOUT:HD_WOUT + H2, :],
                      preferred_element_type=f32)
              + head_ref[HD_BOUT:HD_BOUT + 1, :])                      # (B, LANE)

    # ---- single lane-dense output slab: [logits_pad128 | embeddings_pad128] ----
    emb_pad = jnp.concatenate([pooled, jnp.zeros((B, LANE - D), f32)], axis=-1)
    out_ref[...] = jnp.concatenate([logits, emb_pad], axis=-1)         # (B, 2*LANE)


def internvl2_receipt_classifier_forward(pixel_values, params):
    """pixel_values: [B, C, H, W] float32 (NCHW). Returns dict(logits, embeddings)."""
    b, c, hh, ww = pixel_values.shape
    assert (b, c, hh, ww) == (B, C, H, W)
    f32, bf16 = jnp.float32, jnp.bfloat16

    # patch extraction (glue): NCHW -> (B*N, C*P*P); whole batch in one bf16 slab
    patches = pixel_values.reshape(b, c, hh // P, P, ww // P, P)
    patches = patches.transpose(0, 2, 4, 1, 3, 5).reshape(BN, PD).astype(bf16)

    # ---- host-side folding + slab packing (constant-ish work under jit) ----
    scale = D ** -0.5
    w_qkv, b_qkv = params["w_qkv"], params["b_qkv"]
    w_q = w_qkv[:, :D] * scale                 # fold 1/sqrt(D) into q
    w_k = w_qkv[:, D:2 * D]
    w_v = w_qkv[:, 2 * D:]
    b_q = b_qkv[:, :D] * scale
    b_k = b_qkv[:, D:2 * D]
    b_v = b_qkv[:, 2 * D:]

    wenc = jnp.concatenate(
        [params["w_pe"], w_q, w_k, w_v, params["w_o"], params["w_m2"]], axis=0
    ).astype(bf16)                                                     # (320, D)
    assert wenc.shape == (WE_ROWS, D)

    pos = jnp.tile(params["pos"] + params["b_pe"], (b, 1))             # (BN, D)
    misc = jnp.concatenate(
        [pos, params["ln1"], b_q, b_k, b_v, params["b_o"], params["ln2"],
         params["b_m2"]], axis=0).astype(f32)                          # (41, D)
    assert misc.shape == (MS_ROWS, D)

    def fold_bn(w, bias, bn_p):
        gamma, beta, mean, var = bn_p[0], bn_p[1], bn_p[2], bn_p[3]
        s = gamma * lax.rsqrt(var + BN_EPS)
        return w * s[None, :], (bias - mean[None, :]) * s[None, :] + beta[None, :]

    w_c1f, b_c1f = fold_bn(params["w_c1"], params["b_c1"], params["bn1"])
    w_c2f, b_c2f = fold_bn(params["w_c2"], params["b_c2"], params["bn2"])

    def pad_lanes(a):
        return jnp.pad(a, ((0, 0), (0, LANE - a.shape[1])))

    head = jnp.concatenate(
        [
            pad_lanes(w_c1f),                                   # rows [0, 32)
            pad_lanes(b_c1f),                                   # row 32
            pad_lanes(b_c2f),                                   # row 33
            pad_lanes(params["b_out"]),                         # row 34
            pad_lanes(params["b_m1"]),                          # row 35
            jnp.zeros((HD_WC2 - (HD_BM1 + 1), LANE), f32),      # rows 36..39 (align pad)
            pad_lanes(w_c2f),                                   # rows [40, 104)
            pad_lanes(params["w_out"]),                         # rows [104, 136)
        ],
        axis=0,
    ).astype(f32)                                                      # (136, LANE)
    assert head.shape == (HD_ROWS, LANE)

    wm1 = params["w_m1"].astype(bf16)                                  # (D, MLP)

    # advisory cost estimate (static Python ints)
    flops = 2 * (
        BN * PD * D + 3 * BN * D * D + 2 * BN * BN * D + BN * D * D
        + 2 * BN * D * MLP + B * BN * D
        + B * D * LANE + B * H1 * LANE + B * H2 * LANE
    )
    transcendentals = BN * BN + 2 * (BN * MLP + 2 * B * LANE)
    bytes_accessed = (
        BN * PD * 2 + WE_ROWS * D * 2 + MS_ROWS * D * 4
        + D * MLP * 2 + HD_ROWS * LANE * 4 + B * 2 * LANE * 4
    )

    # Single fused invocation (no grid): total resident footprint is ~110 KiB,
    # so all operands live as whole arrays in VMEM; no pipelining/tiling needed.
    out = pl.pallas_call(
        _forward_kernel,
        out_shape=jax.ShapeDtypeStruct((B, 2 * LANE), f32),
        cost_estimate=pl.CostEstimate(
            flops=flops, transcendentals=transcendentals,
            bytes_accessed=bytes_accessed),
    )(patches, wenc, misc, wm1, head)

    return {"logits": out[:, :NUM_CLASSES],
            "embeddings": out[:, LANE:LANE + D]}


def init_params(key):
    ks = jax.random.split(key, 16)
    scale = 0.02

    def nrm(k, shape):
        return (scale * jax.random.normal(k, shape)).astype(jnp.float32)

    params = {
        # patch embedding (equivalent to stride-P conv) + positional embedding
        "w_pe": nrm(ks[0], (PD, D)),
        "b_pe": jnp.zeros((1, D), jnp.float32),
        "pos": nrm(ks[1], (N, D)),
        # transformer block
        "ln1": jnp.stack([jnp.ones((D,)), jnp.zeros((D,))]).astype(jnp.float32),
        "w_qkv": nrm(ks[2], (D, 3 * D)),
        "b_qkv": jnp.zeros((1, 3 * D), jnp.float32),
        "w_o": nrm(ks[3], (D, D)),
        "b_o": jnp.zeros((1, D), jnp.float32),
        "ln2": jnp.stack([jnp.ones((D,)), jnp.zeros((D,))]).astype(jnp.float32),
        "w_m1": nrm(ks[4], (D, MLP)),
        "b_m1": jnp.zeros((1, MLP), jnp.float32),
        "w_m2": nrm(ks[5], (MLP, D)),
        "b_m2": jnp.zeros((1, D), jnp.float32),
        # classification head (eval-mode BatchNorm: gamma, beta, run_mean, run_var)
        "w_c1": nrm(ks[6], (D, H1)),
        "b_c1": jnp.zeros((1, H1), jnp.float32),
        "bn1": jnp.stack(
            [jnp.ones((H1,)), jnp.zeros((H1,)), jnp.zeros((H1,)), jnp.ones((H1,))]
        ).astype(jnp.float32),
        "w_c2": nrm(ks[7], (H1, H2)),
        "b_c2": jnp.zeros((1, H2), jnp.float32),
        "bn2": jnp.stack(
            [jnp.ones((H2,)), jnp.zeros((H2,)), jnp.zeros((H2,)), jnp.ones((H2,))]
        ).astype(jnp.float32),
        "w_out": nrm(ks[8], (H2, NUM_CLASSES)),
        "b_out": jnp.zeros((1, NUM_CLASSES), jnp.float32),
    }
    return params


if __name__ == "__main__":
    key = jax.random.PRNGKey(0)
    k_x, k_p = jax.random.split(key)
    pixel_values = jax.random.normal(k_x, (B, C, H, W), dtype=jnp.float32)
    params = init_params(k_p)

    fwd = jax.jit(internvl2_receipt_classifier_forward)
    out = fwd(pixel_values, params)
    jax.block_until_ready(out)

    assert out["logits"].shape == (B, NUM_CLASSES)
    assert out["embeddings"].shape == (B, D)
    assert jnp.all(jnp.isfinite(out["logits"]))
    assert jnp.all(jnp.isfinite(out["embeddings"]))
    # TODO(synk): pretrained InternVL2 vision-encoder weights cannot be loaded;
    # encoder here is a deterministic synthetic ViT block with identical dataflow.
    print("KERNEL_OK")
</pallas_src>

<mosaic_0001>
module attributes {stable_mosaic.version = 11 : i64} {
  func.func @_forward_kernel(%arg0: memref<32x64xbf16, #tpu.memory_space<vmem>>, %arg1: memref<320x32xbf16, #tpu.memory_space<vmem>>, %arg2: memref<41x32xf32, #tpu.memory_space<vmem>>, %arg3: memref<32x128xbf16, #tpu.memory_space<vmem>>, %arg4: memref<136x128xf32, #tpu.memory_space<vmem>>, %arg5: memref<2x256xf32, #tpu.memory_space<vmem>>) attributes {dimension_semantics = [], scalar_prefetch = 0 : i64, scratch_operands = 0 : i64, tpu.core_type = #tpu.core_type<tc>} {
    %c0 = arith.constant 0 : index
    %c0_0 = arith.constant 0 : index
    %0 = vector.load %arg0[%c0, %c0_0] : memref<32x64xbf16, #tpu.memory_space<vmem>>, vector<32x64xbf16>
    %c0_1 = arith.constant 0 : index
    %c0_2 = arith.constant 0 : index
    %1 = vector.load %arg1[%c0_1, %c0_2] : memref<320x32xbf16, #tpu.memory_space<vmem>>, vector<64x32xbf16>
    %cst = arith.constant dense<0.000000e+00> : vector<32x32xf32>
    %2 = tpu.matmul %0, %1, %cst {dimension_numbers = #tpu.dot_dimension_numbers<[1], [0], [0], [1], [0, 0, 1, 1], [], []>} : vector<32x64xbf16>, vector<64x32xbf16>, vector<32x32xf32> -> vector<32x32xf32>
    %c0_3 = arith.constant 0 : index
    %c0_4 = arith.constant 0 : index
    %3 = vector.load %arg2[%c0_3, %c0_4] : memref<41x32xf32, #tpu.memory_space<vmem>>, vector<32x32xf32>
    %4 = arith.addf %2, %3 : vector<32x32xf32>
    %c32 = arith.constant 32 : index
    %c0_5 = arith.constant 0 : index
    %5 = vector.load %arg2[%c32, %c0_5] : memref<41x32xf32, #tpu.memory_space<vmem>>, vector<1x32xf32>
    %c33 = arith.constant 33 : index
    %c0_6 = arith.constant 0 : index
    %6 = vector.load %arg2[%c33, %c0_6] : memref<41x32xf32, #tpu.memory_space<vmem>>, vector<1x32xf32>
    %cst_7 = arith.constant dense<0.000000e+00> : vector<32xf32>
    %7 = vector.multi_reduction <add>, %4, %cst_7 [1] : vector<32x32xf32> to vector<32xf32>
    %8 = vector.shape_cast %7 : vector<32xf32> to vector<32x1xf32>
    %cst_8 = arith.constant 3.200000e+01 : f32
    %9 = vector.broadcast %cst_8 : f32 to vector<32x1xf32>
    %10 = arith.divf %8, %9 : vector<32x1xf32>
    %11 = vector.broadcast %10 : vector<32x1xf32> to vector<32x32xf32>
    %12 = arith.subf %4, %11 : vector<32x32xf32>
    %13 = arith.mulf %12, %12 : vector<32x32xf32>
    %cst_9 = arith.constant dense<0.000000e+00> : vector<32xf32>
    %14 = vector.multi_reduction <add>, %13, %cst_9 [1] : vector<32x32xf32> to vector<32xf32>
    %15 = vector.shape_cast %14 : vector<32xf32> to vector<32x1xf32>
    %cst_10 = arith.constant 3.200000e+01 : f32
    %16 = vector.broadcast %cst_10 : f32 to vector<32x1xf32>
    %17 = arith.divf %15, %16 : vector<32x1xf32>
    %18 = vector.broadcast %10 : vector<32x1xf32> to vector<32x32xf32>
    %19 = arith.subf %4, %18 : vector<32x32xf32>
    %cst_11 = arith.constant 9.99999997E-7 : f32
    %20 = vector.broadcast %cst_11 : f32 to vector<32x1xf32>
    %21 = arith.addf %17, %20 : vector<32x1xf32>
    %22 = math.rsqrt %21 : vector<32x1xf32>
    %23 = vector.broadcast %22 : vector<32x1xf32> to vector<32x32xf32>
    %24 = arith.mulf %19, %23 : vector<32x32xf32>
    %25 = vector.broadcast %5 : vector<1x32xf32> to vector<32x32xf32>
    %26 = arith.mulf %24, %25 : vector<32x32xf32>
    %27 = vector.broadcast %6 : vector<1x32xf32> to vector<32x32xf32>
    %28 = arith.addf %26, %27 : vector<32x32xf32>
    %29 = arith.truncf %28 : vector<32x32xf32> to vector<32x32xbf16>
    %c64 = arith.constant 64 : index
    %c0_12 = arith.constant 0 : index
    %30 = vector.load %arg1[%c64, %c0_12] : memref<320x32xbf16, #tpu.memory_space<vmem>>, vector<32x32xbf16>
    %cst_13 = arith.constant dense<0.000000e+00> : vector<32x32xf32>
    %31 = tpu.matmul %29, %30, %cst_13 {dimension_numbers = #tpu.dot_dimension_numbers<[1], [0], [0], [1], [0, 0, 1, 1], [], []>} : vector<32x32xbf16>, vector<32x32xbf16>, vector<32x32xf32> -> vector<32x32xf32>
    %c34 = arith.constant 34 : index
    %c0_14 = arith.constant 0 : index
    %32 = vector.load %arg2[%c34, %c0_14] : memref<41x32xf32, #tpu.memory_space<vmem>>, vector<1x32xf32>
    %33 = vector.broadcast %32 : vector<1x32xf32> to vector<32x32xf32>
    %34 = arith.addf %31, %33 : vector<32x32xf32>
    %c96 = arith.constant 96 : index
    %c0_15 = arith.constant 0 : index
    %35 = vector.load %arg1[%c96, %c0_15] : memref<320x32xbf16, #tpu.memory_space<vmem>>, vector<32x32xbf16>
    %cst_16 = arith.constant dense<0.000000e+00> : vector<32x32xf32>
    %36 = tpu.matmul %29, %35, %cst_16 {dimension_numbers = #tpu.dot_dimension_numbers<[1], [0], [0], [1], [0, 0, 1, 1], [], []>} : vector<32x32xbf16>, vector<32x32xbf16>, vector<32x32xf32> -> vector<32x32xf32>
    %c35 = arith.constant 35 : index
    %c0_17 = arith.constant 0 : index
    %37 = vector.load %arg2[%c35, %c0_17] : memref<41x32xf32, #tpu.memory_space<vmem>>, vector<1x32xf32>
    %38 = vector.broadcast %37 : vector<1x32xf32> to vector<32x32xf32>
    %39 = arith.addf %36, %38 : vector<32x32xf32>
    %c128 = arith.constant 128 : index
    %c0_18 = arith.constant 0 : index
    %40 = vector.load %arg1[%c128, %c0_18] : memref<320x32xbf16, #tpu.memory_space<vmem>>, vector<32x32xbf16>
    %cst_19 = arith.constant dense<0.000000e+00> : vector<32x32xf32>
    %41 = tpu.matmul %29, %40, %cst_19 {dimension_numbers = #tpu.dot_dimension_numbers<[1], [0], [0], [1], [0, 0, 1, 1], [], []>} : vector<32x32xbf16>, vector<32x32xbf16>, vector<32x32xf32> -> vector<32x32xf32>
    %c36 = arith.constant 36 : index
    %c0_20 = arith.constant 0 : index
    %42 = vector.load %arg2[%c36, %c0_20] : memref<41x32xf32, #tpu.memory_space<vmem>>, vector<1x32xf32>
    %43 = vector.broadcast %42 : vector<1x32xf32> to vector<32x32xf32>
    %44 = arith.addf %41, %43 : vector<32x32xf32>
    %45 = arith.truncf %34 : vector<32x32xf32> to vector<32x32xbf16>
    %46 = arith.truncf %39 : vector<32x32xf32> to vector<32x32xbf16>
    %cst_21 = arith.constant dense<0.000000e+00> : vector<32x32xf32>
    %47 = tpu.matmul %45, %46, %cst_21 {dimension_numbers = #tpu.dot_dimension_numbers<[1], [1], [0], [0], [0, 0, 1, 0], [], []>} : vector<32x32xbf16>, vector<32x32xbf16>, vector<32x32xf32> -> vector<32x32xf32>
    %48 = tpu.iota {dimensions = array<i32: 0>} : vector<32x32xi32>
    %c4_i32 = arith.constant 4 : i32
    %49 = vector.broadcast %c4_i32 : i32 to vector<32x32xi32>
    %50 = arith.shrsi %48, %49 : vector<32x32xi32>
    %51 = tpu.iota {dimensions = array<i32: 1>} : vector<32x32xi32>
    %c4_i32_22 = arith.constant 4 : i32
    %52 = vector.broadcast %c4_i32_22 : i32 to vector<32x32xi32>
    %53 = arith.shrsi %51, %52 : vector<32x32xi32>
    %54 = arith.cmpi eq, %50, %53 : vector<32x32xi32>
    %cst_23 = arith.constant -1.000000e+30 : f32
    %55 = vector.broadcast %cst_23 : f32 to vector<32x32xf32>
    %56 = arith.select %54, %47, %55 : vector<32x32xi1>, vector<32x32xf32>
    %cst_24 = arith.constant dense<0xFF800000> : vector<32xf32>
    %57 = vector.multi_reduction <maximumf>, %56, %cst_24 [1] : vector<32x32xf32> to vector<32xf32>
    %58 = vector.shape_cast %57 : vector<32xf32> to vector<32x1xf32>
    %59 = vector.broadcast %58 : vector<32x1xf32> to vector<32x32xf32>
    %60 = arith.subf %56, %59 : vector<32x32xf32>
    %61 = math.exp %60 : vector<32x32xf32>
    %cst_25 = arith.constant dense<0.000000e+00> : vector<32xf32>
    %62 = vector.multi_reduction <add>, %61, %cst_25 [1] : vector<32x32xf32> to vector<32xf32>
    %63 = vector.shape_cast %62 : vector<32xf32> to vector<32x1xf32>
    %64 = vector.broadcast %63 : vector<32x1xf32> to vector<32x32xf32>
    %65 = arith.divf %61, %64 : vector<32x32xf32>
    %66 = arith.truncf %65 : vector<32x32xf32> to vector<32x32xbf16>
    %67 = arith.truncf %44 : vector<32x32xf32> to vector<32x32xbf16>
    %cst_26 = arith.constant dense<0.000000e+00> : vector<32x32xf32>
    %68 = tpu.matmul %66, %67, %cst_26 {dimension_numbers = #tpu.dot_dimension_numbers<[1], [0], [0], [1], [0, 0, 1, 1], [], []>} : vector<32x32xbf16>, vector<32x32xbf16>, vector<32x32xf32> -> vector<32x32xf32>
    %69 = arith.truncf %68 : vector<32x32xf32> to vector<32x32xbf16>
    %c160 = arith.constant 160 : index
    %c0_27 = arith.constant 0 : index
    %70 = vector.load %arg1[%c160, %c0_27] : memref<320x32xbf16, #tpu.memory_space<vmem>>, vector<32x32xbf16>
    %cst_28 = arith.constant dense<0.000000e+00> : vector<32x32xf32>
    %71 = tpu.matmul %69, %70, %cst_28 {dimension_numbers = #tpu.dot_dimension_numbers<[1], [0], [0], [1], [0, 0, 1, 1], [], []>} : vector<32x32xbf16>, vector<32x32xbf16>, vector<32x32xf32> -> vector<32x32xf32>
    %72 = arith.addf %4, %71 : vector<32x32xf32>
    %c37 = arith.constant 37 : index
    %c0_29 = arith.constant 0 : index
    %73 = vector.load %arg2[%c37, %c0_29] : memref<41x32xf32, #tpu.memory_space<vmem>>, vector<1x32xf32>
    %74 = vector.broadcast %73 : vector<1x32xf32> to vector<32x32xf32>
    %75 = arith.addf %72, %74 : vector<32x32xf32>
    %c38 = arith.constant 38 : index
    %c0_30 = arith.constant 0 : index
    %76 = vector.load %arg2[%c38, %c0_30] : memref<41x32xf32, #tpu.memory_space<vmem>>, vector<1x32xf32>
    %c39 = arith.constant 39 : index
    %c0_31 = arith.constant 0 : index
    %77 = vector.load %arg2[%c39, %c0_31] : memref<41x32xf32, #tpu.memory_space<vmem>>, vector<1x32xf32>
    %cst_32 = arith.constant dense<0.000000e+00> : vector<32xf32>
    %78 = vector.multi_reduction <add>, %75, %cst_32 [1] : vector<32x32xf32> to vector<32xf32>
    %79 = vector.shape_cast %78 : vector<32xf32> to vector<32x1xf32>
    %cst_33 = arith.constant 3.200000e+01 : f32
    %80 = vector.broadcast %cst_33 : f32 to vector<32x1xf32>
    %81 = arith.divf %79, %80 : vector<32x1xf32>
    %82 = vector.broadcast %81 : vector<32x1xf32> to vector<32x32xf32>
    %83 = arith.subf %75, %82 : vector<32x32xf32>
    %84 = arith.mulf %83, %83 : vector<32x32xf32>
    %cst_34 = arith.constant dense<0.000000e+00> : vector<32xf32>
    %85 = vector.multi_reduction <add>, %84, %cst_34 [1] : vector<32x32xf32> to vector<32xf32>
    %86 = vector.shape_cast %85 : vector<32xf32> to vector<32x1xf32>
    %cst_35 = arith.constant 3.200000e+01 : f32
    %87 = vector.broadcast %cst_35 : f32 to vector<32x1xf32>
    %88 = arith.divf %86, %87 : vector<32x1xf32>
    %89 = vector.broadcast %81 : vector<32x1xf32> to vector<32x32xf32>
    %90 = arith.subf %75, %89 : vector<32x32xf32>
    %cst_36 = arith.constant 9.99999997E-7 : f32
    %91 = vector.broadcast %cst_36 : f32 to vector<32x1xf32>
    %92 = arith.addf %88, %91 : vector<32x1xf32>
    %93 = math.rsqrt %92 : vector<32x1xf32>
    %94 = vector.broadcast %93 : vector<32x1xf32> to vector<32x32xf32>
    %95 = arith.mulf %90, %94 : vector<32x32xf32>
    %96 = vector.broadcast %76 : vector<1x32xf32> to vector<32x32xf32>
    %97 = arith.mulf %95, %96 : vector<32x32xf32>
    %98 = vector.broadcast %77 : vector<1x32xf32> to vector<32x32xf32>
    %99 = arith.addf %97, %98 : vector<32x32xf32>
    %100 = arith.truncf %99 : vector<32x32xf32> to vector<32x32xbf16>
    %c0_37 = arith.constant 0 : index
    %c0_38 = arith.constant 0 : index
    %101 = vector.load %arg3[%c0_37, %c0_38] : memref<32x128xbf16, #tpu.memory_space<vmem>>, vector<32x128xbf16>
    %cst_39 = arith.constant dense<0.000000e+00> : vector<32x128xf32>
    %102 = tpu.matmul %100, %101, %cst_39 {dimension_numbers = #tpu.dot_dimension_numbers<[1], [0], [0], [1], [0, 0, 1, 1], [], []>} : vector<32x32xbf16>, vector<32x128xbf16>, vector<32x128xf32> -> vector<32x128xf32>
    %c35_40 = arith.constant 35 : index
    %c0_41 = arith.constant 0 : index
    %103 = vector.load %arg4[%c35_40, %c0_41] : memref<136x128xf32, #tpu.memory_space<vmem>>, vector<1x128xf32>
    %104 = vector.broadcast %103 : vector<1x128xf32> to vector<32x128xf32>
    %105 = arith.addf %102, %104 : vector<32x128xf32>
    %cst_42 = arith.constant 5.000000e-01 : f32
    %106 = vector.broadcast %cst_42 : f32 to vector<32x128xf32>
    %107 = arith.mulf %106, %105 : vector<32x128xf32>
    %cst_43 = arith.constant 0.707106769 : f32
    %108 = vector.broadcast %cst_43 : f32 to vector<32x128xf32>
    %109 = arith.mulf %105, %108 : vector<32x128xf32>
    %110 = math.absf %109 : vector<32x128xf32>
    %cst_44 = arith.constant 5.000000e-01 : f32
    %111 = vector.broadcast %cst_44 : f32 to vector<32x128xf32>
    %112 = arith.mulf %111, %110 : vector<32x128xf32>
    %cst_45 = arith.constant 1.000000e+00 : f32
    %113 = vector.broadcast %cst_45 : f32 to vector<32x128xf32>
    %114 = arith.addf %113, %112 : vector<32x128xf32>
    %115 = tpu.reciprocal %114 {approx = true} : vector<32x128xf32> -> vector<32x128xf32>
    %cst_46 = arith.constant 0.170872763 : f32
    %116 = vector.broadcast %cst_46 : f32 to vector<32x128xf32>
    %117 = arith.mulf %115, %116 : vector<32x128xf32>
    %cst_47 = arith.constant -0.822152256 : f32
    %118 = vector.broadcast %cst_47 : f32 to vector<32x128xf32>
    %119 = arith.addf %118, %117 : vector<32x128xf32>
    %120 = arith.mulf %115, %119 : vector<32x128xf32>
    %cst_48 = arith.constant 1.48851585 : f32
    %121 = vector.broadcast %cst_48 : f32 to vector<32x128xf32>
    %122 = arith.addf %121, %120 : vector<32x128xf32>
    %123 = arith.mulf %115, %122 : vector<32x128xf32>
    %cst_49 = arith.constant -1.13520396 : f32
    %124 = vector.broadcast %cst_49 : f32 to vector<32x128xf32>
    %125 = arith.addf %124, %123 : vector<32x128xf32>
    %126 = arith.mulf %115, %125 : vector<32x128xf32>
    %cst_50 = arith.constant 0.278868079 : f32
    %127 = vector.broadcast %cst_50 : f32 to vector<32x128xf32>
    %128 = arith.addf %127, %126 : vector<32x128xf32>
    %129 = arith.mulf %115, %128 : vector<32x128xf32>
    %cst_51 = arith.constant -0.186288059 : f32
    %130 = vector.broadcast %cst_51 : f32 to vector<32x128xf32>
    %131 = arith.addf %130, %129 : vector<32x128xf32>
    %132 = arith.mulf %115, %131 : vector<32x128xf32>
    %cst_52 = arith.constant 0.0967841818 : f32
    %133 = vector.broadcast %cst_52 : f32 to vector<32x128xf32>
    %134 = arith.addf %133, %132 : vector<32x128xf32>
    %135 = arith.mulf %115, %134 : vector<32x128xf32>
    %cst_53 = arith.constant 0.374091953 : f32
    %136 = vector.broadcast %cst_53 : f32 to vector<32x128xf32>
    %137 = arith.addf %136, %135 : vector<32x128xf32>
    %138 = arith.mulf %115, %137 : vector<32x128xf32>
    %cst_54 = arith.constant 1.00002372 : f32
    %139 = vector.broadcast %cst_54 : f32 to vector<32x128xf32>
    %140 = arith.addf %139, %138 : vector<32x128xf32>
    %141 = arith.mulf %115, %140 : vector<32x128xf32>
    %cst_55 = arith.constant -1.26551223 : f32
    %142 = vector.broadcast %cst_55 : f32 to vector<32x128xf32>
    %143 = arith.addf %142, %141 : vector<32x128xf32>
    %cst_56 = arith.constant 0.000000e+00 : f32
    %144 = vector.broadcast %cst_56 : f32 to vector<32x128xf32>
    %145 = arith.subf %144, %110 : vector<32x128xf32>
    %146 = arith.mulf %145, %110 : vector<32x128xf32>
    %147 = arith.addf %146, %143 : vector<32x128xf32>
    %148 = math.exp %147 : vector<32x128xf32>
    %149 = arith.mulf %115, %148 : vector<32x128xf32>
    %cst_57 = arith.constant 1.000000e+00 : f32
    %150 = vector.broadcast %cst_57 : f32 to vector<32x128xf32>
    %151 = arith.subf %150, %149 : vector<32x128xf32>
    %cst_58 = arith.constant 0.000000e+00 : f32
    %152 = vector.broadcast %cst_58 : f32 to vector<32x128xf32>
    %153 = arith.cmpf oge, %109, %152 : vector<32x128xf32>
    %cst_59 = arith.constant 0.000000e+00 : f32
    %154 = vector.broadcast %cst_59 : f32 to vector<32x128xf32>
    %155 = arith.subf %154, %151 : vector<32x128xf32>
    %156 = arith.select %153, %151, %155 : vector<32x128xi1>, vector<32x128xf32>
    %cst_60 = arith.constant 1.000000e+00 : f32
    %157 = vector.broadcast %cst_60 : f32 to vector<32x128xf32>
    %158 = arith.addf %157, %156 : vector<32x128xf32>
    %159 = arith.mulf %107, %158 : vector<32x128xf32>
    %160 = arith.truncf %159 : vector<32x128xf32> to vector<32x128xbf16>
    %c192 = arith.constant 192 : index
    %c0_61 = arith.constant 0 : index
    %161 = vector.load %arg1[%c192, %c0_61] : memref<320x32xbf16, #tpu.memory_space<vmem>>, vector<128x32xbf16>
    %cst_62 = arith.constant dense<0.000000e+00> : vector<32x32xf32>
    %162 = tpu.matmul %160, %161, %cst_62 {dimension_numbers = #tpu.dot_dimension_numbers<[1], [0], [0], [1], [0, 0, 1, 1], [], []>} : vector<32x128xbf16>, vector<128x32xbf16>, vector<32x32xf32> -> vector<32x32xf32>
    %c40 = arith.constant 40 : index
    %c0_63 = arith.constant 0 : index
    %163 = vector.load %arg2[%c40, %c0_63] : memref<41x32xf32, #tpu.memory_space<vmem>>, vector<1x32xf32>
    %164 = vector.broadcast %163 : vector<1x32xf32> to vector<32x32xf32>
    %165 = arith.addf %162, %164 : vector<32x32xf32>
    %166 = arith.addf %75, %165 : vector<32x32xf32>
    %167 = tpu.iota {dimensions = array<i32: 0>} : vector<2x32xi32>
    %168 = tpu.iota {dimensions = array<i32: 1>} : vector<2x32xi32>
    %c4_i32_64 = arith.constant 4 : i32
    %169 = vector.broadcast %c4_i32_64 : i32 to vector<2x32xi32>
    %170 = arith.shrsi %168, %169 : vector<2x32xi32>
    %171 = arith.cmpi eq, %167, %170 : vector<2x32xi32>
    %cst_65 = arith.constant 6.250000e-02 : f32
    %cst_66 = arith.constant 0.000000e+00 : f32
    %172 = vector.broadcast %cst_65 : f32 to vector<2x32xf32>
    %173 = vector.broadcast %cst_66 : f32 to vector<2x32xf32>
    %174 = arith.select %171, %172, %173 : vector<2x32xi1>, vector<2x32xf32>
    %cst_67 = arith.constant dense<0.000000e+00> : vector<2x32xf32>
    %175 = tpu.matmul %174, %166, %cst_67 {dimension_numbers = #tpu.dot_dimension_numbers<[1], [0], [0], [1], [0, 0, 1, 1], [], []>} : vector<2x32xf32>, vector<32x32xf32>, vector<2x32xf32> -> vector<2x32xf32>
    %c0_68 = arith.constant 0 : index
    %c0_69 = arith.constant 0 : index
    %176 = vector.load %arg4[%c0_68, %c0_69] : memref<136x128xf32, #tpu.memory_space<vmem>>, vector<32x128xf32>
    %cst_70 = arith.constant dense<0.000000e+00> : vector<2x128xf32>
    %177 = tpu.matmul %175, %176, %cst_70 {dimension_numbers = #tpu.dot_dimension_numbers<[1], [0], [0], [1], [0, 0, 1, 1], [], []>} : vector<2x32xf32>, vector<32x128xf32>, vector<2x128xf32> -> vector<2x128xf32>
    %c32_71 = arith.constant 32 : index
    %c0_72 = arith.constant 0 : index
    %178 = vector.load %arg4[%c32_71, %c0_72] : memref<136x128xf32, #tpu.memory_space<vmem>>, vector<1x128xf32>
    %179 = vector.broadcast %178 : vector<1x128xf32> to vector<2x128xf32>
    %180 = arith.addf %177, %179 : vector<2x128xf32>
    %cst_73 = arith.constant 5.000000e-01 : f32
    %181 = vector.broadcast %cst_73 : f32 to vector<2x128xf32>
    %182 = arith.mulf %181, %180 : vector<2x128xf32>
    %cst_74 = arith.constant 0.707106769 : f32
    %183 = vector.broadcast %cst_74 : f32 to vector<2x128xf32>
    %184 = arith.mulf %180, %183 : vector<2x128xf32>
    %185 = math.absf %184 : vector<2x128xf32>
    %cst_75 = arith.constant 5.000000e-01 : f32
    %186 = vector.broadcast %cst_75 : f32 to vector<2x128xf32>
    %187 = arith.mulf %186, %185 : vector<2x128xf32>
    %cst_76 = arith.constant 1.000000e+00 : f32
    %188 = vector.broadcast %cst_76 : f32 to vector<2x128xf32>
    %189 = arith.addf %188, %187 : vector<2x128xf32>
    %190 = tpu.reciprocal %189 {approx = true} : vector<2x128xf32> -> vector<2x128xf32>
    %cst_77 = arith.constant 0.170872763 : f32
    %191 = vector.broadcast %cst_77 : f32 to vector<2x128xf32>
    %192 = arith.mulf %190, %191 : vector<2x128xf32>
    %cst_78 = arith.constant -0.822152256 : f32
    %193 = vector.broadcast %cst_78 : f32 to vector<2x128xf32>
    %194 = arith.addf %193, %192 : vector<2x128xf32>
    %195 = arith.mulf %190, %194 : vector<2x128xf32>
    %cst_79 = arith.constant 1.48851585 : f32
    %196 = vector.broadcast %cst_79 : f32 to vector<2x128xf32>
    %197 = arith.addf %196, %195 : vector<2x128xf32>
    %198 = arith.mulf %190, %197 : vector<2x128xf32>
    %cst_80 = arith.constant -1.13520396 : f32
    %199 = vector.broadcast %cst_80 : f32 to vector<2x128xf32>
    %200 = arith.addf %199, %198 : vector<2x128xf32>
    %201 = arith.mulf %190, %200 : vector<2x128xf32>
    %cst_81 = arith.constant 0.278868079 : f32
    %202 = vector.broadcast %cst_81 : f32 to vector<2x128xf32>
    %203 = arith.addf %202, %201 : vector<2x128xf32>
    %204 = arith.mulf %190, %203 : vector<2x128xf32>
    %cst_82 = arith.constant -0.186288059 : f32
    %205 = vector.broadcast %cst_82 : f32 to vector<2x128xf32>
    %206 = arith.addf %205, %204 : vector<2x128xf32>
    %207 = arith.mulf %190, %206 : vector<2x128xf32>
    %cst_83 = arith.constant 0.0967841818 : f32
    %208 = vector.broadcast %cst_83 : f32 to vector<2x128xf32>
    %209 = arith.addf %208, %207 : vector<2x128xf32>
    %210 = arith.mulf %190, %209 : vector<2x128xf32>
    %cst_84 = arith.constant 0.374091953 : f32
    %211 = vector.broadcast %cst_84 : f32 to vector<2x128xf32>
    %212 = arith.addf %211, %210 : vector<2x128xf32>
    %213 = arith.mulf %190, %212 : vector<2x128xf32>
    %cst_85 = arith.constant 1.00002372 : f32
    %214 = vector.broadcast %cst_85 : f32 to vector<2x128xf32>
    %215 = arith.addf %214, %213 : vector<2x128xf32>
    %216 = arith.mulf %190, %215 : vector<2x128xf32>
    %cst_86 = arith.constant -1.26551223 : f32
    %217 = vector.broadcast %cst_86 : f32 to vector<2x128xf32>
    %218 = arith.addf %217, %216 : vector<2x128xf32>
    %cst_87 = arith.constant 0.000000e+00 : f32
    %219 = vector.broadcast %cst_87 : f32 to vector<2x128xf32>
    %220 = arith.subf %219, %185 : vector<2x128xf32>
    %221 = arith.mulf %220, %185 : vector<2x128xf32>
    %222 = arith.addf %221, %218 : vector<2x128xf32>
    %223 = math.exp %222 : vector<2x128xf32>
    %224 = arith.mulf %190, %223 : vector<2x128xf32>
    %cst_88 = arith.constant 1.000000e+00 : f32
    %225 = vector.broadcast %cst_88 : f32 to vector<2x128xf32>
    %226 = arith.subf %225, %224 : vector<2x128xf32>
    %cst_89 = arith.constant 0.000000e+00 : f32
    %227 = vector.broadcast %cst_89 : f32 to vector<2x128xf32>
    %228 = arith.cmpf oge, %184, %227 : vector<2x128xf32>
    %cst_90 = arith.constant 0.000000e+00 : f32
    %229 = vector.broadcast %cst_90 : f32 to vector<2x128xf32>
    %230 = arith.subf %229, %226 : vector<2x128xf32>
    %231 = arith.select %228, %226, %230 : vector<2x128xi1>, vector<2x128xf32>
    %cst_91 = arith.constant 1.000000e+00 : f32
    %232 = vector.broadcast %cst_91 : f32 to vector<2x128xf32>
    %233 = arith.addf %232, %231 : vector<2x128xf32>
    %234 = arith.mulf %182, %233 : vector<2x128xf32>
    %235 = vector.extract_strided_slice %234 {offsets = [0, 0], sizes = [2, 64], strides = [1, 1]} : vector<2x128xf32> to vector<2x64xf32>
    %c40_92 = arith.constant 40 : index
    %c0_93 = arith.constant 0 : index
    %236 = vector.load %arg4[%c40_92, %c0_93] : memref<136x128xf32, #tpu.memory_space<vmem>>, vector<64x128xf32>
    %cst_94 = arith.constant dense<0.000000e+00> : vector<2x128xf32>
    %237 = tpu.matmul %235, %236, %cst_94 {dimension_numbers = #tpu.dot_dimension_numbers<[1], [0], [0], [1], [0, 0, 1, 1], [], []>} : vector<2x64xf32>, vector<64x128xf32>, vector<2x128xf32> -> vector<2x128xf32>
    %c33_95 = arith.constant 33 : index
    %c0_96 = arith.constant 0 : index
    %238 = vector.load %arg4[%c33_95, %c0_96] : memref<136x128xf32, #tpu.memory_space<vmem>>, vector<1x128xf32>
    %239 = vector.broadcast %238 : vector<1x128xf32> to vector<2x128xf32>
    %240 = arith.addf %237, %239 : vector<2x128xf32>
    %cst_97 = arith.constant 5.000000e-01 : f32
    %241 = vector.broadcast %cst_97 : f32 to vector<2x128xf32>
    %242 = arith.mulf %241, %240 : vector<2x128xf32>
    %cst_98 = arith.constant 0.707106769 : f32
    %243 = vector.broadcast %cst_98 : f32 to vector<2x128xf32>
    %244 = arith.mulf %240, %243 : vector<2x128xf32>
    %245 = math.absf %244 : vector<2x128xf32>
    %cst_99 = arith.constant 5.000000e-01 : f32
    %246 = vector.broadcast %cst_99 : f32 to vector<2x128xf32>
    %247 = arith.mulf %246, %245 : vector<2x128xf32>
    %cst_100 = arith.constant 1.000000e+00 : f32
    %248 = vector.broadcast %cst_100 : f32 to vector<2x128xf32>
    %249 = arith.addf %248, %247 : vector<2x128xf32>
    %250 = tpu.reciprocal %249 {approx = true} : vector<2x128xf32> -> vector<2x128xf32>
    %cst_101 = arith.constant 0.170872763 : f32
    %251 = vector.broadcast %cst_101 : f32 to vector<2x128xf32>
    %252 = arith.mulf %250, %251 : vector<2x128xf32>
    %cst_102 = arith.constant -0.822152256 : f32
    %253 = vector.broadcast %cst_102 : f32 to vector<2x128xf32>
    %254 = arith.addf %253, %252 : vector<2x128xf32>
    %255 = arith.mulf %250, %254 : vector<2x128xf32>
    %cst_103 = arith.constant 1.48851585 : f32
    %256 = vector.broadcast %cst_103 : f32 to vector<2x128xf32>
    %257 = arith.addf %256, %255 : vector<2x128xf32>
    %258 = arith.mulf %250, %257 : vector<2x128xf32>
    %cst_104 = arith.constant -1.13520396 : f32
    %259 = vector.broadcast %cst_104 : f32 to vector<2x128xf32>
    %260 = arith.addf %259, %258 : vector<2x128xf32>
    %261 = arith.mulf %250, %260 : vector<2x128xf32>
    %cst_105 = arith.constant 0.278868079 : f32
    %262 = vector.broadcast %cst_105 : f32 to vector<2x128xf32>
    %263 = arith.addf %262, %261 : vector<2x128xf32>
    %264 = arith.mulf %250, %263 : vector<2x128xf32>
    %cst_106 = arith.constant -0.186288059 : f32
    %265 = vector.broadcast %cst_106 : f32 to vector<2x128xf32>
    %266 = arith.addf %265, %264 : vector<2x128xf32>
    %267 = arith.mulf %250, %266 : vector<2x128xf32>
    %cst_107 = arith.constant 0.0967841818 : f32
    %268 = vector.broadcast %cst_107 : f32 to vector<2x128xf32>
    %269 = arith.addf %268, %267 : vector<2x128xf32>
    %270 = arith.mulf %250, %269 : vector<2x128xf32>
    %cst_108 = arith.constant 0.374091953 : f32
    %271 = vector.broadcast %cst_108 : f32 to vector<2x128xf32>
    %272 = arith.addf %271, %270 : vector<2x128xf32>
    %273 = arith.mulf %250, %272 : vector<2x128xf32>
    %cst_109 = arith.constant 1.00002372 : f32
    %274 = vector.broadcast %cst_109 : f32 to vector<2x128xf32>
    %275 = arith.addf %274, %273 : vector<2x128xf32>
    %276 = arith.mulf %250, %275 : vector<2x128xf32>
    %cst_110 = arith.constant -1.26551223 : f32
    %277 = vector.broadcast %cst_110 : f32 to vector<2x128xf32>
    %278 = arith.addf %277, %276 : vector<2x128xf32>
    %cst_111 = arith.constant 0.000000e+00 : f32
    %279 = vector.broadcast %cst_111 : f32 to vector<2x128xf32>
    %280 = arith.subf %279, %245 : vector<2x128xf32>
    %281 = arith.mulf %280, %245 : vector<2x128xf32>
    %282 = arith.addf %281, %278 : vector<2x128xf32>
    %283 = math.exp %282 : vector<2x128xf32>
    %284 = arith.mulf %250, %283 : vector<2x128xf32>
    %cst_112 = arith.constant 1.000000e+00 : f32
    %285 = vector.broadcast %cst_112 : f32 to vector<2x128xf32>
    %286 = arith.subf %285, %284 : vector<2x128xf32>
    %cst_113 = arith.constant 0.000000e+00 : f32
    %287 = vector.broadcast %cst_113 : f32 to vector<2x128xf32>
    %288 = arith.cmpf oge, %244, %287 : vector<2x128xf32>
    %cst_114 = arith.constant 0.000000e+00 : f32
    %289 = vector.broadcast %cst_114 : f32 to vector<2x128xf32>
    %290 = arith.subf %289, %286 : vector<2x128xf32>
    %291 = arith.select %288, %286, %290 : vector<2x128xi1>, vector<2x128xf32>
    %cst_115 = arith.constant 1.000000e+00 : f32
    %292 = vector.broadcast %cst_115 : f32 to vector<2x128xf32>
    %293 = arith.addf %292, %291 : vector<2x128xf32>
    %294 = arith.mulf %242, %293 : vector<2x128xf32>
    %295 = vector.extract_strided_slice %294 {offsets = [0, 0], sizes = [2, 32], strides = [1, 1]} : vector<2x128xf32> to vector<2x32xf32>
    %c104 = arith.constant 104 : index
    %c0_116 = arith.constant 0 : index
    %296 = vector.load %arg4[%c104, %c0_116] : memref<136x128xf32, #tpu.memory_space<vmem>>, vector<32x128xf32>
    %cst_117 = arith.constant dense<0.000000e+00> : vector<2x128xf32>
    %297 = tpu.matmul %295, %296, %cst_117 {dimension_numbers = #tpu.dot_dimension_numbers<[1], [0], [0], [1], [0, 0, 1, 1], [], []>} : vector<2x32xf32>, vector<32x128xf32>, vector<2x128xf32> -> vector<2x128xf32>
    %c34_118 = arith.constant 34 : index
    %c0_119 = arith.constant 0 : index
    %298 = vector.load %arg4[%c34_118, %c0_119] : memref<136x128xf32, #tpu.memory_space<vmem>>, vector<1x128xf32>
    %299 = vector.broadcast %298 : vector<1x128xf32> to vector<2x128xf32>
    %300 = arith.addf %297, %299 : vector<2x128xf32>
    %cst_120 = arith.constant 0.000000e+00 : f32
    %301 = vector.broadcast %cst_120 : f32 to vector<2x96xf32>
    %302 = tpu.concatenate %175, %301 in 1 : vector<2x32xf32>, vector<2x96xf32> -> vector<2x128xf32>
    %303 = tpu.concatenate %300, %302 in 1 : vector<2x128xf32>, vector<2x128xf32> -> vector<2x256xf32>
    %c0_121 = arith.constant 0 : index
    %c0_122 = arith.constant 0 : index
    %304 = vector.load %arg5[%c0_121, %c0_122] : memref<2x256xf32, #tpu.memory_space<vmem>>, vector<2x256xf32>
    tpu.vector_store %arg5[%c0_121, %c0_122], %303 {strides = array<i32>} : memref<2x256xf32, #tpu.memory_space<vmem>>, vector<2x256xf32>,
    return
  }
}

</mosaic_0001>

<bundles_post_ra>
// kernel: internvl2_receipt_classifier_forward.1
= control target key start
LH: loop header
LB: loop body
LE: loop exit
PB: predicated region body
PF: predicated region fallthrough
CT: control target
= control target key end

     0   :  { %vm71_vm0 = vcmask 523264   ;;  %vm129_vm1 = vcmask 261120   ;;  %vm1903_vm10 = vmmov 0   ;;  %s2330_s1 = inlined_call_operand.vmem [shape: bf16[320,32], index: 1, kind: input, shape index: {}]   ;;  %s2331_s0 = inlined_call_operand.vmem [shape: bf16[32,64], index: 0, kind: input, shape index: {}]   ;;  %s2332_s2 = inlined_call_operand.vmem [shape: f32[41,32], index: 2, kind: input, shape index: {}]   ;;  %s2333_s3 = inlined_call_operand.vmem [shape: bf16[32,128], index: 3, kind: input, shape index: {}]   ;;  %s2334_s4 = inlined_call_operand.vmem [shape: f32[136,128], index: 4, kind: input, shape index: {}]   ;;  %s2335_s5 = inlined_call_operand.vmem [shape: f32[2,256], index: 5, kind: output, shape index: {}]  }
   0x1   :  { %v1822_v0 = vld [vmem:[%s2330_s1] sm:$0xff]   ;;  %v1823_v1 = vld [vmem:[%s2330_s1 + $0x8] sm:$0xff]   ;;  %v1824_v2 = vld [vmem:[%s2330_s1 + $0x10] sm:$0xff]  }
   0x2   :  { %1647 = vmatprep.subr.bf16.mxu0 %v1822_v0  ;;  %v1826_v3 = vld [vmem:[%s2331_s0] sm:$0xff]   ;;  %v1825_v4 = vld [vmem:[%s2330_s1 + $0x18] sm:$0xff]   ;;  %v1827_v5 = vld [vmem:[%s2331_s0 + $0x8] sm:$0xff]  }
   0x3   :  { %1648 = vmatpush3.bf16.msra.mxu0 %v1822_v0  ;;  %1655 = vmatprep.mubr.msk.bf16.mxu0 %vm71_vm0, %v1826_v3  ;;  %v35_v6 = vld [vmem:[%s2332_s2 + $0x10] sm:$0xff]  ;;  %v33_v7 = vld [vmem:[%s2332_s2] sm:$0xff]  ;;  %v36_v9 = vld [vmem:[%s2332_s2 + $0x18] sm:$0xff] }
   0x4   :  { %1649 = vmatprep.subr.bf16.mxu0 %v1823_v1  ;;  %v34_v12 = vld [vmem:[%s2332_s2 + $0x8] sm:$0xff]  ;;  %v1828_v42 = vld [vmem:[%s2330_s1 + $0x20] sm:$0xff]   ;;  %v1832_v46 = vld [vmem:[%s2330_s1 + $0x30] sm:$0xff]  }
   0x5   :  { %v1829_v43 = vld [vmem:[%s2330_s1 + $0x40] sm:$0xff]   ;;  %v1830_v44 = vld [vmem:[%s2330_s1 + $0x28] sm:$0xff]   ;;  %1659 = vmatprep.subr.bf16.mxu1 %v1828_v42 }
   0x6   :  { %1660 = vmatpush3.bf16.msra.mxu1 %v1828_v42  ;;  %v1831_v45 = vld [vmem:[%s2330_s1 + $0x48] sm:$0xff]   ;;  %v1529_v61 = vld [vmem:[%s2332_s2 + $0x20] ss:$0 sm:$0xff]  ;;  %v1530_v3 = vld [vmem:[%s2332_s2 + $0x21] ss:$0 sm:$0xff] }
   0x7   :  { %1650 = vmatpush3.bf16.msra.mxu0 %v1823_v1  ;;  %1661 = vmatprep.subr.bf16.mxu1 %v1830_v44 }
   0x8   :  { %1651 = vmatprep.subr.bf16.mxu0 %v1824_v2 }
   0xa   :  { %1662 = vmatpush3.bf16.msra.mxu1 %v1830_v44 }
   0xb   :  { %1652 = vmatpush3.bf16.msra.mxu0 %v1824_v2  ;;  %1667 = vmatprep.subr.bf16.mxu1 %v1832_v46 }
   0xc   :  { %1653 = vmatprep.subr.bf16.mxu0 %v1825_v4 }
   0xf   :  { %1654 = vmatpush3.bf16.msra.mxu0 %v1825_v4 }
  0x10   :  { %1675 = vmatprep.subr.bf16.mxu0 %v1829_v43 }
  0x12   :  { %1656 = vmatmul.mubr.msk.bf16.vlgmr.msra.gmra.mrb[0].mxu0 %vm71_vm0, %v1827_v5 }
  0x13   :  { %1676 = vmatpush3.bf16.msra.mxu0 %v1829_v43  ;;  %v1536_v43 = vld [vmem:[%s2332_s2 + $0x23] ss:$0 sm:$0xff] }
  0x14   :  { %1677 = vmatprep.subr.bf16.mxu0 %v1831_v45 }
  0x17   :  { %1678 = vmatpush3.bf16.msra.mxu0 %v1831_v45 }
  0xe5   :  { %v1657_v8 = vpop.f32.mrb[0].mxu0 }
  0xe6   :  { %v1964_v10 = vadd.f32 %v1657_v8, %v35_v6  ;;  %v112_v11 = vpop.f32.mrb[1].mxu0 }
  0xe7   :  { %v1969_v13 = vadd.f32 %v112_v11, %v33_v7  ;;  %v1658_v14 = vpop.f32.mrb[2].mxu0 }
  0xe8   :  { %v1971_v15 = vadd.f32 %v1658_v14, %v36_v9  ;;  %v115_v16 = vpop.f32.mrb[3].mxu0  ;;  %v136_v17 = vsel %vm129_vm1, %v1964_v10, 0.0 }
  0xe9   :  { %v1975_v18 = vadd.f32 %v115_v16, %v34_v12  ;;  %137 = vadd.xlane.f32.xlu1 %v136_v17  ;;  %v130_v19 = vsel %vm129_vm1, %v1969_v13, 0.0 }
  0xea   :  { %131 = vadd.xlane.f32.xlu0 %v130_v19  ;;  %v139_v20 = vsel %vm129_vm1, %v1971_v15, 0.0  ;;  %v1833_v19 = vld [vmem:[%s2330_s1 + $0x38] sm:$0xff]  }
  0xeb   :  { %v133_v21 = vsel %vm129_vm1, %v1975_v18, 0.0 }
  0xed   :  { %140 = vadd.xlane.f32.xlu1 %v139_v20 }
  0xee   :  { %134 = vadd.xlane.f32.xlu0 %v133_v21  ;;  %v1531_v21 = vld [vmem:[%s2332_s2 + $0x22] ss:$0 sm:$0xff] }
 0x176   :  { %v138_v22 = vpop.xlane.xlu1 %137 }
 0x177   :  { %v145_v23 = vmul.f32 0.03125, %v138_v22  ;;  %v132_v24 = vpop.xlane.xlu0 %131 }
 0x178   :  { %v143_v25 = vmul.f32 0.03125, %v132_v24 }
 0x179   :  { %v149_v26 = vsub.f32 %v1964_v10, %v145_v23  ;;  %v1541_v23 = vld [vmem:[%s2332_s2 + $0x24] ss:$0 sm:$0xff] }
 0x17a   :  { %v147_v27 = vsub.f32 %v1969_v13, %v143_v25  ;;  %v141_v28 = vpop.xlane.xlu1 %140 }
 0x17b   :  { %v146_v29 = vmul.f32 0.03125, %v141_v28  ;;  %v135_v30 = vpop.xlane.xlu0 %134  ;;  %v153_v36 = vmul.f32 %v149_v26, %v149_v26 }
 0x17c   :  { %v144_v31 = vmul.f32 0.03125, %v135_v30  ;;  %v151_v32 = vmul.f32 %v147_v27, %v147_v27 }
 0x17d   :  { %v150_v33 = vsub.f32 %v1971_v15, %v146_v29  ;;  %v161_v38 = vsel %vm129_vm1, %v153_v36, 0.0 }
 0x17e   :  { %v148_v34 = vsub.f32 %v1975_v18, %v144_v31  ;;  %v155_v35 = vsel %vm129_vm1, %v151_v32, 0.0 }
 0x17f   :  { %156 = vadd.xlane.f32.xlu0 %v155_v35  ;;  %v154_v40 = vmul.f32 %v150_v33, %v150_v33 }
 0x180   :  { %v152_v37 = vmul.f32 %v148_v34, %v148_v34 }
 0x181   :  { %v164_v41 = vsel %vm129_vm1, %v154_v40, 0.0 }
 0x182   :  { %v158_v39 = vsel %vm129_vm1, %v152_v37, 0.0 }
 0x183   :  { %162 = vadd.xlane.f32.xlu0 %v161_v38  ;;  %159 = vadd.xlane.f32.xlu1 %v158_v39 }
 0x187   :  { %165 = vadd.xlane.f32.xlu1 %v164_v41 }
 0x20c   :  { %v157_v47 = vpop.xlane.xlu0 %156 }
 0x20d   :  { %v167_v48 = vmul.f32 0.03125, %v157_v47 }
 0x20f   :  { %v171_v49 = vadd.f32 1e-06, %v167_v48 }
 0x210   :  { %v160_v50 = vpop.xlane.xlu1 %159  ;;  %v163_v51 = vpop.xlane.xlu0 %162 }
 0x211   :  { %1846 = vrsqrt.f32 %v171_v49  ;;  %v168_v52 = vmul.f32 0.03125, %v160_v50  ;;  %v169_v53 = vmul.f32 0.03125, %v163_v51 }
 0x213   :  { %v172_v54 = vadd.f32 1e-06, %v168_v52  ;;  %v173_v55 = vadd.f32 1e-06, %v169_v53 }
 0x214   :  { %v166_v56 = vpop.xlane.xlu1 %165 }
 0x215   :  { %1848 = vrsqrt.f32 %v172_v54  ;;  %v170_v57 = vmul.f32 0.03125, %v166_v56 }
 0x216   :  { %1850 = vrsqrt.f32 %v173_v55  ;;  %v482_v55 = vlaneseq }
 0x217   :  { %v174_v58 = vadd.f32 1e-06, %v170_v57 }
 0x218   :  { %v2036_v56 = vshrl.u32 %v482_v55, 7  ;;  %v492_v57 = vand.u32 127, %v482_v55 }
 0x219   :  { %1852 = vrsqrt.f32 %v174_v58 }
 0x21a   :  { %v485_v58 = vadd.s32 16, %v2036_v56 }
 0x21b   :  { %v1847_v59 = vpop.eup %1846 }
 0x21c   :  { %v179_v60 = vmul.f32 %v1847_v59, %v147_v27  ;;  %v484_v59 = vadd.s32 8, %v2036_v56 }
 0x21e   :  { %v187_v1 = vmul.f32 %v1529_v61, %v179_v60  ;;  %v2040_v60 = vshra.s32 %v492_v57, 4 }
 0x21f   :  { %v1849_v62 = vpop.eup %1848 }
 0x220   :  { %v1851_v63 = vpop.eup %1850  ;;  %v180_v0 = vmul.f32 %v1849_v62, %v148_v34  ;;  %v195_v7 = vadd.f32 %v1530_v3, %v187_v1  ;;  %v486_v62 = vadd.s32 24, %v2036_v56  ;;  %vm1107_vm11 = vcmp.eq.s32.totalorder %v2036_v56, %v2040_v60 }
 0x221   :  { %v181_v2 = vmul.f32 %v1851_v63, %v149_v26  ;;  %v489_v63 = vshra.s32 %v485_v58, 4 }
 0x222   :  { %v188_v4 = vmul.f32 %v1529_v61, %v180_v0  ;;  %v488_v0 = vshra.s32 %v484_v59, 4  ;;  %v490_v1 = vshra.s32 %v486_v62, 4 }
 0x223   :  { %v1853_v5 = vpop.eup %1852  ;;  %v189_v9 = vmul.f32 %v1529_v61, %v181_v2  ;;  %vm496_vm3 = vcmp.eq.s32.totalorder %v489_v63, %v2040_v60  ;;  %v1554_v63 = vld [vmem:[%s2332_s2 + $0x25] ss:$0 sm:$0xff] }
 0x224   :  { %v182_v6 = vmul.f32 %v1853_v5, %v150_v33  ;;  %v196_v8 = vadd.f32 %v1530_v3, %v188_v4  ;;  %vm495_vm4 = vcmp.eq.s32.totalorder %v488_v0, %v2040_v60  ;;  %vm497_vm5 = vcmp.eq.s32.totalorder %v490_v1, %v2040_v60 }
 0x225   :  { %v197_v14 = vadd.f32 %v1530_v3, %v189_v9 }
 0x226   :  { %v199_v11 = vpack.c.bf16 %v196_v8, %v195_v7  ;;  %v190_v12 = vmul.f32 %v1529_v61, %v182_v6  ;;  %v487_v61 = vshra.s32 %v2036_v56, 4  ;;  %v1185_v56 = vld [vmem:[%s2334_s4 + $0x18] sm:$0xff] }
 0x228   :  { %1663 = vmatprep.mubr.msk.bf16.mxu1 %vm129_vm1, %v199_v11  ;;  %1679 = vmatprep.mubr.msk.bf16.mxu0 %vm129_vm1, %v199_v11  ;;  %v198_v16 = vadd.f32 %v1530_v3, %v190_v12  ;;  %vm494_vm2 = vcmp.eq.s32.totalorder %v487_v61, %v2040_v60 }
 0x22a   :  { %v200_v17 = vpack.c.bf16 %v198_v16, %v197_v14 }
 0x22c   :  { %1664 = vmatmul.mubr.msk.bf16.vlgmr.msra.gmra.mrb[0].mxu1 %vm129_vm1, %v200_v17  ;;  %1680 = vmatmul.mubr.msk.bf16.vlgmr.msra.gmra.mrb[4].mxu0 %vm129_vm1, %v200_v17 }
 0x22d   :  { %1668 = vmatpush3.bf16.msra.mxu1 %v1832_v46  ;;  %1671 = vmatprep.mubr.msk.bf16.mxu1 %vm129_vm1, %v199_v11 }
 0x22e   :  { %1669 = vmatprep.subr.bf16.mxu1 %v1833_v19 }
 0x231   :  { %1670 = vmatpush3.bf16.msra.mxu1 %v1833_v19 }
 0x234   :  { %1672 = vmatmul.mubr.msk.bf16.vlgmr.msra.gmra.mrb[4].mxu1 %vm129_vm1, %v200_v17 }
 0x2ff   :  { %v1665_v20 = vpop.f32.mrb[0].mxu1  ;;  %v1681_v22 = vpop.f32.mrb[4].mxu0 }
 0x300   :  { %v262_v24 = vpop.f32.mrb[1].mxu1  ;;  %v402_v25 = vpop.f32.mrb[5].mxu0  ;;  %v271_v28 = vadd.f32 %v1665_v20, %v1531_v21  ;;  %v411_v29 = vadd.f32 %v1681_v22, %v1541_v23 }
 0x301   :  { %v1666_v26 = vpop.f32.mrb[2].mxu1  ;;  %v1682_v27 = vpop.f32.mrb[6].mxu0  ;;  %v263_v34 = vadd.f32 %v1531_v21, %v262_v24  ;;  %v403_v35 = vadd.f32 %v1541_v23, %v402_v25 }
 0x302   :  { %v274_v30 = vadd.f32 %v1666_v26, %v1531_v21  ;;  %v414_v31 = vadd.f32 %v1682_v27, %v1541_v23  ;;  %v265_v32 = vpop.f32.mrb[3].mxu1  ;;  %v405_v33 = vpop.f32.mrb[7].mxu0 }
 0x303   :  { %v266_v36 = vadd.f32 %v1531_v21, %v265_v32  ;;  %v406_v37 = vadd.f32 %v1541_v23, %v405_v33 }
 0x304   :  { %v418_v38 = vpack.c.bf16 %v274_v30, %v271_v28  ;;  %v549_v39 = vpack.c.bf16 %v414_v31, %v411_v29 }
 0x305   :  { %v417_v40 = vpack.c.bf16 %v266_v36, %v263_v34  ;;  %v548_v41 = vpack.c.bf16 %v406_v37, %v403_v35 }
 0x307   :  { %v1673_v42 = vpop.f32.mrb[4].mxu1  ;;  %1687 = vmatprep.mubr.msk.bf16.mxu1 %vm129_vm1, %v417_v40  ;;  %1691 = vmatprep.subr.bf16.mxu0 %v548_v41 }
 0x308   :  { %v332_v44 = vpop.f32.mrb[5].mxu1  ;;  %1692 = vmatpush3.bf16.msra.mxu0 %v548_v41  ;;  %v341_v46 = vadd.f32 %v1673_v42, %v1536_v43 }
 0x309   :  { %v1674_v45 = vpop.f32.mrb[6].mxu1  ;;  %1693 = vmatprep.subr.bf16.mxu0 %v549_v39  ;;  %v333_v49 = vadd.f32 %v1536_v43, %v332_v44 }
 0x30a   :  { %v344_v47 = vadd.f32 %v1674_v45, %v1536_v43  ;;  %v335_v48 = vpop.f32.mrb[7].mxu1 }
 0x30b   :  { %v336_v50 = vadd.f32 %v1536_v43, %v335_v48 }
 0x30c   :  { %v420_v51 = vpack.c.bf16 %v344_v47, %v341_v46  ;;  %1694 = vmatpush3.bf16.msra.mxu0 %v549_v39 }
 0x30d   :  { %v419_v52 = vpack.c.bf16 %v336_v50, %v333_v49 }
 0x30e   :  { %v431_v54 = vsel %vm129_vm1, %v420_v51, 0 }
 0x30f   :  { %1817 = vmatprep.subr.msk.bf16.mxu1 %vm129_vm1, %v419_v52  ;;  %v428_v53 = vsel %vm129_vm1, %v419_v52, 0 }
 0x310   :  { %1684 = vmatpush3.bf16.xpose.msra.mxu1 %v428_v53  ;;  %v1835_v53 = vld [vmem:[%s2330_s1 + $0x58] sm:$0xff]  }
 0x311   :  { %1818 = vmatprep.subr.msk.bf16.mxu1 %vm129_vm1, %v420_v51 }
 0x318   :  { %1686 = vmatpush3.bf16.xpose.msra.mxu1 %v431_v54 }
 0x31f   :  { %1688 = vmatmul.mubr.msk.bf16.vlgmr.msra.gmra.mrb[8].mxu1 %vm129_vm1, %v418_v38  ;;  %v1834_v38 = vld [vmem:[%s2330_s1 + $0x50] sm:$0xff]  }
 0x320   :  { %1699 = vmatprep.subr.bf16.mxu0 %v1834_v38 }
 0x3f2   :  { %v1689_v2 = vpop.f32.mrb[8].mxu1 }
 0x3f3   :  { %v467_v3 = vpop.f32.mrb[9].mxu1  ;;  %v500_v8 = vsel %vm496_vm3, %v1689_v2, -1e+30 }
 0x3f4   :  { %v498_v4 = vsel %vm494_vm2, %v467_v3, -1e+30  ;;  %v1690_v5 = vpop.f32.mrb[10].mxu1  ;;  %v508_v14 = vsel %vm129_vm1, %v500_v8, -inf }
 0x3f5   :  { %v470_v6 = vpop.f32.mrb[11].mxu1  ;;  %v502_v7 = vsel %vm129_vm1, %v498_v4, -inf  ;;  %v501_v12 = vsel %vm497_vm5, %v1690_v5, -1e+30 }
 0x3f6   :  { %v499_v9 = vsel %vm495_vm4, %v470_v6, -1e+30  ;;  %503 = vmax.xlane.f32.xlu0 %v502_v7  ;;  %v511_v16 = vsel %vm129_vm1, %v501_v12, -inf }
 0x3f7   :  { %v505_v11 = vsel %vm129_vm1, %v499_v9, -inf }
 0x3f8   :  { %506 = vmax.xlane.f32.xlu1 %v505_v11 }
 0x3fa   :  { %509 = vmax.xlane.f32.xlu0 %v508_v14 }
 0x3fc   :  { %512 = vmax.xlane.f32.xlu1 %v511_v16 }
 0x483   :  { %v504_v17 = vpop.xlane.xlu0 %503 }
 0x484   :  { %v514_v19 = vsub.f32 %v498_v4, %v504_v17 }
 0x485   :  { %v507_v20 = vpop.xlane.xlu1 %506 }
 0x486   :  { %v518_v21 = vmul.f32 1.442695, %v514_v19  ;;  %v515_v22 = vsub.f32 %v499_v9, %v507_v20 }
 0x487   :  { %v510_v23 = vpop.xlane.xlu0 %509 }
 0x488   :  { %1854 = vpow2.f32 %v518_v21  ;;  %v520_v24 = vmul.f32 1.442695, %v515_v22  ;;  %v516_v25 = vsub.f32 %v500_v8, %v510_v23 }
 0x489   :  { %v513_v26 = vpop.xlane.xlu1 %512 }
 0x48a   :  { %1856 = vpow2.f32 %v520_v24  ;;  %v522_v27 = vmul.f32 1.442695, %v516_v25  ;;  %v517_v28 = vsub.f32 %v501_v12, %v513_v26 }
 0x48c   :  { %1858 = vpow2.f32 %v522_v27  ;;  %v524_v29 = vmul.f32 1.442695, %v517_v28 }
 0x48e   :  { %1860 = vpow2.f32 %v524_v29 }
 0x492   :  { %v1855_v30 = vpop.eup %1854 }
 0x493   :  { %v526_v31 = vsel %vm129_vm1, %v1855_v30, 0.0 }
 0x494   :  { %v1857_v32 = vpop.eup %1856  ;;  %527 = vadd.xlane.f32.xlu0 %v526_v31 }
 0x495   :  { %v529_v33 = vsel %vm129_vm1, %v1857_v32, 0.0 }
 0x496   :  { %v1859_v34 = vpop.eup %1858  ;;  %530 = vadd.xlane.f32.xlu1 %v529_v33 }
 0x497   :  { %v532_v35 = vsel %vm129_vm1, %v1859_v34, 0.0 }
 0x498   :  { %v1861_v36 = vpop.eup %1860  ;;  %533 = vadd.xlane.f32.xlu0 %v532_v35  ;;  %v1836_v35 = vld [vmem:[%s2333_s3] sm:$0xff]  }
 0x499   :  { %v535_v37 = vsel %vm129_vm1, %v1861_v36, 0.0  ;;  %1707 = vmatprep.subr.bf16.mxu1 %v1836_v35 }
 0x49a   :  { %536 = vadd.xlane.f32.xlu1 %v535_v37  ;;  %1708 = vmatpush3.bf16.msra.mxu1 %v1836_v35 }
 0x521   :  { %v528_v39 = vpop.xlane.xlu0 %527 }
 0x522   :  { %1862 = vrcp.f32 %v528_v39 }
 0x523   :  { %v531_v40 = vpop.xlane.xlu1 %530 }
 0x524   :  { %1864 = vrcp.f32 %v531_v40 }
 0x525   :  { %v534_v41 = vpop.xlane.xlu0 %533 }
 0x526   :  { %1866 = vrcp.f32 %v534_v41 }
 0x527   :  { %v537_v42 = vpop.xlane.xlu1 %536 }
 0x528   :  { %1868 = vrcp.f32 %v537_v42 }
 0x52c   :  { %v1863_v43 = vpop.eup %1862 }
 0x52d   :  { %v539_v45 = vmul.f32 %v1863_v43, %v1855_v30 }
 0x52e   :  { %v1865_v44 = vpop.eup %1864 }
 0x52f   :  { %v541_v46 = vmul.f32 %v1865_v44, %v1857_v32 }
 0x530   :  { %v1867_v47 = vpop.eup %1866 }
 0x531   :  { %v546_v48 = vpack.c.bf16 %v541_v46, %v539_v45  ;;  %v543_v50 = vmul.f32 %v1867_v47, %v1859_v34 }
 0x532   :  { %v1869_v49 = vpop.eup %1868 }
 0x533   :  { %v545_v51 = vmul.f32 %v1869_v49, %v1861_v36  ;;  %1695 = vmatprep.mubr.msk.bf16.mxu0 %vm129_vm1, %v546_v48  ;;  %v1837_v36 = vld [vmem:[%s2333_s3 + $0x8] sm:$0xff]  }
 0x534   :  { %1709 = vmatprep.subr.bf16.mxu1 %v1837_v36 }
 0x535   :  { %v547_v52 = vpack.c.bf16 %v545_v51, %v543_v50  ;;  %1710 = vmatpush3.bf16.msra.mxu1 %v1837_v36  ;;  %v1555_v50 = vld [vmem:[%s2332_s2 + $0x26] ss:$0 sm:$0xff] }
 0x537   :  { %1696 = vmatmul.mubr.msk.bf16.vlgmr.msra.gmra.mrb[8].mxu0 %vm129_vm1, %v547_v52 }
 0x538   :  { %1700 = vmatpush3.bf16.msra.mxu0 %v1834_v38 }
 0x539   :  { %1701 = vmatprep.subr.bf16.mxu0 %v1835_v53 }
 0x53c   :  { %1702 = vmatpush3.bf16.msra.mxu0 %v1835_v53 }
 0x60a   :  { %v1697_v54 = vpop.f32.mrb[8].mxu0 }
 0x60b   :  { %v590_v55 = vpop.f32.mrb[9].mxu0 }
 0x60c   :  { %v1698_v57 = vpop.f32.mrb[10].mxu0 }
 0x60d   :  { %v606_v58 = vpack.c.bf16 %v1698_v57, %v1697_v54  ;;  %v593_v59 = vpop.f32.mrb[11].mxu0  ;;  %v1556_v57 = vld [vmem:[%s2332_s2 + $0x27] ss:$0 sm:$0xff] }
 0x60e   :  { %v605_v61 = vpack.c.bf16 %v593_v59, %v590_v55 }
 0x610   :  { %1703 = vmatprep.mubr.msk.bf16.mxu0 %vm129_vm1, %v605_v61 }
 0x611   :  { %1704 = vmatmul.mubr.msk.bf16.vlgmr.msra.gmra.mrb[12].mxu0 %vm129_vm1, %v606_v58 }
 0x6e4   :  { %v1705_v62 = vpop.f32.mrb[12].mxu0 }
 0x6e5   :  { %v663_v0 = vpop.f32.mrb[13].mxu0  ;;  %v680_v1 = vadd.f32 %v1705_v62, %v1964_v10 }
 0x6e6   :  { %v678_v2 = vadd.f32 %v663_v0, %v1969_v13  ;;  %v1706_v3 = vpop.f32.mrb[14].mxu0 }
 0x6e7   :  { %v666_v4 = vpop.f32.mrb[15].mxu0  ;;  %v681_v6 = vadd.f32 %v1706_v3, %v1971_v15  ;;  %v2075_v8 = vadd.f32 %v1554_v63, %v680_v1 }
 0x6e8   :  { %v2071_v5 = vadd.f32 %v1554_v63, %v678_v2  ;;  %v679_v7 = vadd.f32 %v666_v4, %v1975_v18 }
 0x6e9   :  { %v2081_v12 = vadd.f32 %v1554_v63, %v681_v6  ;;  %v699_v13 = vsel %vm129_vm1, %v2075_v8, 0.0 }
 0x6ea   :  { %v2077_v9 = vadd.f32 %v1554_v63, %v679_v7  ;;  %v693_v11 = vsel %vm129_vm1, %v2071_v5, 0.0 }
 0x6eb   :  { %694 = vadd.xlane.f32.xlu0 %v693_v11  ;;  %v702_v15 = vsel %vm129_vm1, %v2081_v12, 0.0  ;;  %v1838_v11 = vld [vmem:[%s2330_s1 + $0x60] sm:$0xff]  }
 0x6ec   :  { %v696_v10 = vsel %vm129_vm1, %v2077_v9, 0.0  ;;  %1715 = vmatprep.subr.bf16.mxu0 %v1838_v11 }
 0x6ed   :  { %697 = vadd.xlane.f32.xlu1 %v696_v10  ;;  %1716 = vmatpush3.bf16.msra.mxu0 %v1838_v11  ;;  %v1839_v10 = vld [vmem:[%s2330_s1 + $0x68] sm:$0xff]  }
 0x6ee   :  { %1717 = vmatprep.subr.bf16.mxu0 %v1839_v10 }
 0x6ef   :  { %700 = vadd.xlane.f32.xlu0 %v699_v13  ;;  %v1840_v13 = vld [vmem:[%s2330_s1 + $0x70] sm:$0xff]  }
 0x6f1   :  { %703 = vadd.xlane.f32.xlu1 %v702_v15  ;;  %1718 = vmatpush3.bf16.msra.mxu0 %v1839_v10  ;;  %v1841_v15 = vld [vmem:[%s2330_s1 + $0x78] sm:$0xff]  }
 0x6f2   :  { %1719 = vmatprep.subr.bf16.mxu0 %v1840_v13 }
 0x6f5   :  { %1720 = vmatpush3.bf16.msra.mxu0 %v1840_v13 }
 0x6f6   :  { %1721 = vmatprep.subr.bf16.mxu0 %v1841_v15 }
 0x6f9   :  { %1722 = vmatpush3.bf16.msra.mxu0 %v1841_v15 }
 0x778   :  { %v695_v18 = vpop.xlane.xlu0 %694 }
 0x779   :  { %v705_v14 = vmul.f32 0.03125, %v695_v18  ;;  %v1842_v18 = vld [vmem:[%s2330_s1 + $0x80] sm:$0xff]  }
 0x77a   :  { %v698_v16 = vpop.xlane.xlu1 %697  ;;  %1723 = vmatprep.subr.bf16.mxu0 %v1842_v18 }
 0x77b   :  { %v709_v17 = vsub.f32 %v2071_v5, %v705_v14  ;;  %v706_v19 = vmul.f32 0.03125, %v698_v16  ;;  %1724 = vmatpush3.bf16.msra.mxu0 %v1842_v18  ;;  %v1843_v14 = vld [vmem:[%s2330_s1 + $0x88] sm:$0xff]   ;;  %v1844_v16 = vld [vmem:[%s2330_s1 + $0x90] sm:$0xff]  }
 0x77c   :  { %v701_v20 = vpop.xlane.xlu0 %700  ;;  %1725 = vmatprep.subr.bf16.mxu0 %v1843_v14 }
 0x77d   :  { %v710_v21 = vsub.f32 %v2077_v9, %v706_v19  ;;  %v707_v22 = vmul.f32 0.03125, %v701_v20  ;;  %v713_v23 = vmul.f32 %v709_v17, %v709_v17  ;;  %v1557_v19 = vld [vmem:[%s2334_s4 + $0x23] ss:$0 sm:$0xff] }
 0x77e   :  { %v704_v24 = vpop.xlane.xlu1 %703 }
 0x77f   :  { %v711_v25 = vsub.f32 %v2075_v8, %v707_v22  ;;  %v708_v26 = vmul.f32 0.03125, %v704_v24  ;;  %v717_v27 = vsel %vm129_vm1, %v713_v23, 0.0  ;;  %v714_v28 = vmul.f32 %v710_v21, %v710_v21  ;;  %1726 = vmatpush3.bf16.msra.mxu0 %v1843_v14 }
 0x780   :  { %718 = vadd.xlane.f32.xlu0 %v717_v27  ;;  %1727 = vmatprep.subr.bf16.mxu0 %v1844_v16 }
 0x781   :  { %v712_v29 = vsub.f32 %v2081_v12, %v708_v26  ;;  %v720_v30 = vsel %vm129_vm1, %v714_v28, 0.0  ;;  %v715_v31 = vmul.f32 %v711_v25, %v711_v25 }
 0x782   :  { %721 = vadd.xlane.f32.xlu1 %v720_v30 }
 0x783   :  { %v723_v32 = vsel %vm129_vm1, %v715_v31, 0.0  ;;  %v716_v33 = vmul.f32 %v712_v29, %v712_v29  ;;  %1728 = vmatpush3.bf16.msra.mxu0 %v1844_v16 }
 0x784   :  { %724 = vadd.xlane.f32.xlu0 %v723_v32 }
 0x785   :  { %v726_v34 = vsel %vm129_vm1, %v716_v33, 0.0 }
 0x786   :  { %727 = vadd.xlane.f32.xlu1 %v726_v34 }
 0x80d   :  { %v719_v37 = vpop.xlane.xlu0 %718 }
 0x80e   :  { %v729_v38 = vmul.f32 0.03125, %v719_v37 }
 0x80f   :  { %v722_v39 = vpop.xlane.xlu1 %721 }
 0x810   :  { %v733_v40 = vadd.f32 1e-06, %v729_v38  ;;  %v730_v41 = vmul.f32 0.03125, %v722_v39 }
 0x811   :  { %v725_v42 = vpop.xlane.xlu0 %724 }
 0x812   :  { %1870 = vrsqrt.f32 %v733_v40  ;;  %v734_v43 = vadd.f32 1e-06, %v730_v41  ;;  %v731_v44 = vmul.f32 0.03125, %v725_v42 }
 0x813   :  { %v728_v45 = vpop.xlane.xlu1 %727 }
 0x814   :  { %1872 = vrsqrt.f32 %v734_v43  ;;  %v735_v46 = vadd.f32 1e-06, %v731_v44  ;;  %v732_v47 = vmul.f32 0.03125, %v728_v45 }
 0x816   :  { %1874 = vrsqrt.f32 %v735_v46  ;;  %v736_v48 = vadd.f32 1e-06, %v732_v47 }
 0x818   :  { %1876 = vrsqrt.f32 %v736_v48 }
 0x81c   :  { %v1871_v49 = vpop.eup %1870 }
 0x81d   :  { %v741_v51 = vmul.f32 %v1871_v49, %v709_v17  ;;  %v1845_v17 = vld [vmem:[%s2330_s1 + $0x98] sm:$0xff]  }
 0x81e   :  { %v1873_v52 = vpop.eup %1872  ;;  %1729 = vmatprep.subr.bf16.mxu0 %v1845_v17 }
 0x81f   :  { %v742_v53 = vmul.f32 %v1873_v52, %v710_v21  ;;  %v749_v54 = vmul.f32 %v1555_v50, %v741_v51  ;;  %1730 = vmatpush3.bf16.msra.mxu0 %v1845_v17 }
 0x820   :  { %v1875_v55 = vpop.eup %1874 }
 0x821   :  { %v743_v58 = vmul.f32 %v1875_v55, %v711_v25  ;;  %v750_v59 = vmul.f32 %v1555_v50, %v742_v53  ;;  %v757_v0 = vadd.f32 %v1556_v57, %v749_v54 }
 0x822   :  { %v1877_v61 = vpop.eup %1876 }
 0x823   :  { %v751_v62 = vmul.f32 %v1555_v50, %v743_v58  ;;  %v744_v63 = vmul.f32 %v1877_v61, %v712_v29  ;;  %v758_v1 = vadd.f32 %v1556_v57, %v750_v59 }
 0x825   :  { %v752_v2 = vmul.f32 %v1555_v50, %v744_v63  ;;  %v761_v3 = vpack.c.bf16 %v758_v1, %v757_v0  ;;  %v759_v4 = vadd.f32 %v1556_v57, %v751_v62 }
 0x827   :  { %1711 = vmatprep.mubr.msk.bf16.mxu1 %vm129_vm1, %v761_v3  ;;  %v760_v6 = vadd.f32 %v1556_v57, %v752_v2 }
 0x829   :  { %v762_v7 = vpack.c.bf16 %v760_v6, %v759_v4 }
 0x82b   :  { %1712 = vmatmul.mubr.msk.bf16.vlgmr.msra.gmra.mrb[12].mxu1 %vm129_vm1, %v762_v7 }
 0x8fe   :  { %v1713_v20 = vpop.f32.mrb[12].mxu1 }
 0x8ff   :  { %v2138_v21 = vadd.f32 %v1713_v20, %v1557_v19  ;;  %v824_v22 = vpop.f32.mrb[13].mxu1 }
 0x900   :  { %v2140_v23 = vadd.f32 %v1557_v19, %v824_v22  ;;  %v1714_v24 = vpop.f32.mrb[14].mxu1 }
 0x901   :  { %v2143_v25 = vmul.f32 0.70710677, %v2138_v21  ;;  %v2145_v26 = vadd.f32 %v1714_v24, %v1557_v19  ;;  %v827_v27 = vpop.f32.mrb[15].mxu1 }
 0x902   :  { %v2148_v28 = vmul.f32 0.70710677, %v2140_v23  ;;  %v2150_v29 = vadd.f32 %v1557_v19, %v827_v27 }
 0x903   :  { %v2153_v30 = vand.u32 2147483647, %v2143_v25  ;;  %v2156_v31 = vmul.f32 0.70710677, %v2145_v26  ;;  %vm965_vm6 = vcmp.ge.f32.partialorder %v2143_v25, 0.0 }
 0x904   :  { %v2159_v32 = vand.u32 2147483647, %v2148_v28  ;;  %v2162_v33 = vmul.f32 0.70710677, %v2150_v29  ;;  %vm963_vm7 = vcmp.ge.f32.partialorder %v2148_v28, 0.0  ;;  %v840_v28 = vmul.f32 0.5, %v2150_v29 }
 0x905   :  { %v853_v34 = vmul.f32 0.5, %v2153_v30  ;;  %v2166_v35 = vand.u32 2147483647, %v2156_v31  ;;  %vm966_vm8 = vcmp.ge.f32.partialorder %v2156_v31, 0.0 }
 0x906   :  { %v851_v36 = vmul.f32 0.5, %v2159_v32  ;;  %v2170_v37 = vand.u32 2147483647, %v2162_v33  ;;  %vm964_vm9 = vcmp.ge.f32.partialorder %v2162_v33, 0.0  ;;  %v1904_v33 = vmov 0.0  }
 0x907   :  { %v857_v38 = vadd.f32 1.0, %v853_v34  ;;  %v854_v39 = vmul.f32 0.5, %v2166_v35  ;;  %1743 = vmatprep.mubr.msk.f32.mxu1 %vm1903_vm10, %v1904_v33 }
 0x908   :  { %v855_v40 = vadd.f32 1.0, %v851_v36  ;;  %v852_v41 = vmul.f32 0.5, %v2170_v37 }
 0x909   :  { %1878 = vrcp.f32 %v857_v38  ;;  %v858_v42 = vadd.f32 1.0, %v854_v39 }
 0x90a   :  { %1880 = vrcp.f32 %v855_v40  ;;  %v856_v43 = vadd.f32 1.0, %v852_v41 }
 0x90b   :  { %1882 = vrcp.f32 %v858_v42 }
 0x90c   :  { %1884 = vrcp.f32 %v856_v43 }
 0x913   :  { %v2174_v44 = vpop.eup %1878 }
 0x914   :  { %v2176_v45 = vpop.eup %1880  ;;  %v865_v46 = vmul.f32 0.17087276, %v2174_v44 }
 0x915   :  { %v2179_v47 = vpop.eup %1882  ;;  %v863_v48 = vmul.f32 0.17087276, %v2176_v45 }
 0x916   :  { %v2182_v49 = vpop.eup %1884  ;;  %v869_v50 = vadd.f32 -0.82215226, %v865_v46  ;;  %v866_v51 = vmul.f32 0.17087276, %v2179_v47 }
 0x917   :  { %v867_v52 = vadd.f32 -0.82215226, %v863_v48  ;;  %v864_v53 = vmul.f32 0.17087276, %v2182_v49 }
 0x918   :  { %v873_v54 = vmul.f32 %v2174_v44, %v869_v50  ;;  %v870_v55 = vadd.f32 -0.82215226, %v866_v51 }
 0x919   :  { %v871_v57 = vmul.f32 %v2176_v45, %v867_v52  ;;  %v868_v58 = vadd.f32 -0.82215226, %v864_v53 }
 0x91a   :  { %v877_v59 = vadd.f32 1.4885159, %v873_v54  ;;  %v874_v61 = vmul.f32 %v2179_v47, %v870_v55 }
 0x91b   :  { %v875_v62 = vadd.f32 1.4885159, %v871_v57  ;;  %v872_v63 = vmul.f32 %v2182_v49, %v868_v58 }
 0x91c   :  { %v881_v0 = vmul.f32 %v2174_v44, %v877_v59  ;;  %v878_v1 = vadd.f32 1.4885159, %v874_v61 }
 0x91d   :  { %v879_v2 = vmul.f32 %v2176_v45, %v875_v62  ;;  %v876_v3 = vadd.f32 1.4885159, %v872_v63 }
 0x91e   :  { %v885_v4 = vadd.f32 -1.135204, %v881_v0  ;;  %v882_v6 = vmul.f32 %v2179_v47, %v878_v1 }
 0x91f   :  { %v883_v7 = vadd.f32 -1.135204, %v879_v2  ;;  %v880_v11 = vmul.f32 %v2182_v49, %v876_v3  ;;  %v937_v3 = vsub.f32 0.0, %v2153_v30 }
 0x920   :  { %v889_v10 = vmul.f32 %v2174_v44, %v885_v4  ;;  %v886_v13 = vadd.f32 -1.135204, %v882_v6 }
 0x921   :  { %v887_v15 = vmul.f32 %v2176_v45, %v883_v7  ;;  %v884_v18 = vadd.f32 -1.135204, %v880_v11  ;;  %v935_v7 = vsub.f32 0.0, %v2159_v32 }
 0x922   :  { %v893_v14 = vadd.f32 0.27886808, %v889_v10  ;;  %v890_v16 = vmul.f32 %v2179_v47, %v886_v13 }
 0x923   :  { %v891_v17 = vadd.f32 0.27886808, %v887_v15  ;;  %v888_v19 = vmul.f32 %v2182_v49, %v884_v18  ;;  %v938_v15 = vsub.f32 0.0, %v2166_v35 }
 0x924   :  { %v897_v20 = vmul.f32 %v2174_v44, %v893_v14  ;;  %v894_v22 = vadd.f32 0.27886808, %v890_v16  ;;  %v936_v16 = vsub.f32 0.0, %v2170_v37 }
 0x925   :  { %v895_v24 = vmul.f32 %v2176_v45, %v891_v17  ;;  %v892_v27 = vadd.f32 0.27886808, %v888_v19  ;;  %v941_v19 = vmul.f32 %v937_v3, %v2153_v30  ;;  %v839_v3 = vmul.f32 0.5, %v2140_v23 }
 0x926   :  { %v901_v34 = vadd.f32 -0.18628806, %v897_v20  ;;  %v898_v36 = vmul.f32 %v2179_v47, %v894_v22  ;;  %v1902_v23 = vmov 0.0|0.0  }
 0x927   :  { %v899_v38 = vadd.f32 -0.18628806, %v895_v24  ;;  %v896_v39 = vmul.f32 %v2182_v49, %v892_v27  ;;  %v939_v24 = vmul.f32 %v935_v7, %v2159_v32  ;;  %1787 = vmatprep.subr.bf16.mxu1 %v1902_v23  ;;  %1811 = vmatprep.subr.bf16.mxu0 %v1902_v23 }
 0x928   :  { %v905_v40 = vmul.f32 %v2174_v44, %v901_v34  ;;  %v902_v41 = vadd.f32 -0.18628806, %v898_v36 }
 0x929   :  { %v903_v42 = vmul.f32 %v2176_v45, %v899_v38  ;;  %v900_v43 = vadd.f32 -0.18628806, %v896_v39  ;;  %v942_v38 = vmul.f32 %v938_v15, %v2166_v35 }
 0x92a   :  { %v909_v46 = vadd.f32 0.09678418, %v905_v40  ;;  %v906_v48 = vmul.f32 %v2179_v47, %v902_v41  ;;  %v940_v41 = vmul.f32 %v936_v16, %v2170_v37 }
 0x92b   :  { %v907_v50 = vadd.f32 0.09678418, %v903_v42  ;;  %v904_v51 = vmul.f32 %v2182_v49, %v900_v43 }
 0x92c   :  { %v913_v52 = vmul.f32 %v2174_v44, %v909_v46  ;;  %v910_v53 = vadd.f32 0.09678418, %v906_v48 }
 0x92d   :  { %v911_v54 = vmul.f32 %v2176_v45, %v907_v50  ;;  %v908_v55 = vadd.f32 0.09678418, %v904_v51 }
 0x92e   :  { %v917_v57 = vadd.f32 0.37409195, %v913_v52  ;;  %v914_v58 = vmul.f32 %v2179_v47, %v910_v53 }
 0x92f   :  { %v915_v59 = vadd.f32 0.37409195, %v911_v54  ;;  %v912_v61 = vmul.f32 %v2182_v49, %v908_v55 }
 0x930   :  { %v921_v62 = vmul.f32 %v2174_v44, %v917_v57  ;;  %v918_v63 = vadd.f32 0.37409195, %v914_v58 }
 0x931   :  { %v919_v0 = vmul.f32 %v2176_v45, %v915_v59  ;;  %v916_v1 = vadd.f32 0.37409195, %v912_v61 }
 0x932   :  { %v925_v2 = vadd.f32 1.0000237, %v921_v62  ;;  %v922_v4 = vmul.f32 %v2179_v47, %v918_v63 }
 0x933   :  { %v923_v6 = vadd.f32 1.0000237, %v919_v0  ;;  %v920_v11 = vmul.f32 %v2182_v49, %v916_v1  ;;  %v841_v0 = vmul.f32 0.5, %v2138_v21 }
 0x934   :  { %v929_v10 = vmul.f32 %v2174_v44, %v925_v2  ;;  %v926_v13 = vadd.f32 1.0000237, %v922_v4 }
 0x935   :  { %v927_v18 = vmul.f32 %v2176_v45, %v923_v6  ;;  %v924_v14 = vadd.f32 1.0000237, %v920_v11  ;;  %v842_v6 = vmul.f32 0.5, %v2145_v26  ;;  %v1562_v26 = vld [vmem:[%s2332_s2 + $0x28] ss:$0 sm:$0xff] }
 0x936   :  { %v933_v17 = vadd.f32 -1.2655122, %v929_v10  ;;  %v930_v20 = vmul.f32 %v2179_v47, %v926_v13 }
 0x937   :  { %v931_v22 = vadd.f32 -1.2655122, %v927_v18  ;;  %v928_v27 = vmul.f32 %v2182_v49, %v924_v14 }
 0x938   :  { %v945_v34 = vadd.f32 %v941_v19, %v933_v17  ;;  %v934_v36 = vadd.f32 -1.2655122, %v930_v20 }
 0x939   :  { %v943_v39 = vadd.f32 %v939_v24, %v931_v22  ;;  %v932_v40 = vadd.f32 -1.2655122, %v928_v27 }
 0x93a   :  { %v951_v42 = vmul.f32 1.442695, %v945_v34  ;;  %v946_v43 = vadd.f32 %v942_v38, %v934_v36 }
 0x93b   :  { %v947_v46 = vmul.f32 1.442695, %v943_v39  ;;  %v944_v48 = vadd.f32 %v940_v41, %v932_v40  ;;  %v1182_v41 = vld [vmem:[%s2334_s4] sm:$0xff] }
 0x93c   :  { %1886 = vpow2.f32 %v951_v42  ;;  %v953_v30 = vmul.f32 1.442695, %v946_v43 }
 0x93d   :  { %1888 = vpow2.f32 %v947_v46  ;;  %v949_v50 = vmul.f32 1.442695, %v944_v48  ;;  %v1300_v46 = vld [vmem:[%s2334_s4 + $0x28] sm:$0xff]  ;;  %v1301_v48 = vld [vmem:[%s2334_s4 + $0x30] sm:$0xff] }
 0x93e   :  { %1890 = vpow2.f32 %v953_v30  ;;  %v1800_v30 = vpack.c.bf16 %v1301_v48, %v1300_v46 }
 0x93f   :  { %1892 = vpow2.f32 %v949_v50  ;;  %v1302_v50 = vld [vmem:[%s2334_s4 + $0x38] sm:$0xff] }
 0x946   :  { %v1887_v32 = vpop.eup %1886 }
 0x947   :  { %v1889_v51 = vpop.eup %1888  ;;  %v957_v52 = vmul.f32 %v1887_v32, %v2174_v44  ;;  %v1303_v32 = vld [vmem:[%s2334_s4 + $0x40] sm:$0xff] }
 0x948   :  { %v1891_v53 = vpop.eup %1890  ;;  %v955_v35 = vmul.f32 %v1889_v51, %v2176_v45  ;;  %v1803_v51 = vpack.c.bf16 %v1303_v32, %v1302_v50 }
 0x949   :  { %v1893_v54 = vpop.eup %1892  ;;  %v961_v55 = vsub.f32 1.0, %v957_v52  ;;  %v958_v37 = vmul.f32 %v1891_v53, %v2179_v47  ;;  %v1304_v52 = vld [vmem:[%s2334_s4 + $0x48] sm:$0xff]  ;;  %v1305_v53 = vld [vmem:[%s2334_s4 + $0x50] sm:$0xff] }
 0x94a   :  { %v959_v57 = vsub.f32 1.0, %v955_v35  ;;  %v956_v58 = vmul.f32 %v1893_v54, %v2182_v49  ;;  %v1806_v35 = vpack.c.bf16 %v1305_v53, %v1304_v52  ;;  %v1306_v54 = vld [vmem:[%s2334_s4 + $0x58] sm:$0xff] }
 0x94b   :  { %v969_v59 = vsub.f32 0.0, %v961_v55  ;;  %v962_v61 = vsub.f32 1.0, %v958_v37 }
 0x94c   :  { %v967_v62 = vsub.f32 0.0, %v959_v57  ;;  %v960_v63 = vsub.f32 1.0, %v956_v58 }
 0x94d   :  { %v973_v1 = vsel %vm965_vm6, %v961_v55, %v969_v59  ;;  %v970_v44 = vsub.f32 0.0, %v962_v61  ;;  %v1307_v55 = vld [vmem:[%s2334_s4 + $0x60] sm:$0xff] }
 0x94e   :  { %v977_v45 = vadd.f32 1.0, %v973_v1  ;;  %v971_v2 = vsel %vm963_vm7, %v959_v57, %v967_v62  ;;  %v968_v47 = vsub.f32 0.0, %v960_v63  ;;  %v1809_v37 = vpack.c.bf16 %v1307_v55, %v1306_v54  ;;  %v1572_v57 = vld [vmem:[%s2334_s4 + $0x20] ss:$0 sm:$0xff] }
 0x94f   :  { %v975_v49 = vadd.f32 1.0, %v971_v2  ;;  %v974_v4 = vsel %vm966_vm8, %v962_v61, %v970_v44 }
 0x950   :  { %v981_v25 = vmul.f32 %v977_v45, %v841_v0  ;;  %v978_v7 = vadd.f32 1.0, %v974_v4  ;;  %v972_v21 = vsel %vm964_vm9, %v960_v63, %v968_v47 }
 0x951   :  { %v979_v11 = vmul.f32 %v975_v49, %v839_v3  ;;  %v976_v10 = vadd.f32 1.0, %v972_v21 }
 0x952   :  { %v982_v13 = vmul.f32 %v978_v7, %v842_v6 }
 0x953   :  { %v980_v15 = vmul.f32 %v976_v10, %v840_v28 }
 0x954   :  { %v984_v18 = vpack.c.bf16 %v982_v13, %v981_v25 }
 0x955   :  { %v983_v31 = vpack.c.bf16 %v980_v15, %v979_v11 }
 0x957   :  { %1731 = vmatprep.mubr.bf16.mxu0 %v983_v31 }
 0x958   :  { %1732 = vmatmul.mubr.bf16.vlgmr.msra.gmra.mrb[16].mxu0 %v984_v18 }
 0x959   :  { %1784 = vmatprep.mubr.msk.f32.mxu0 %vm1903_vm10, %v1904_v33 }
 0xa2b   :  { %v1733_v29 = vpop.f32.mrb[16].mxu0 }
 0xa2c   :  { %v1097_v14 = vadd.f32 %v1733_v29, %v1562_v26  ;;  %v1088_v16 = vpop.f32.mrb[17].mxu0 }
 0xa2d   :  { %v1089_v17 = vadd.f32 %v1562_v26, %v1088_v16  ;;  %v1734_v19 = vpop.f32.mrb[18].mxu0 }
 0xa2e   :  { %v1100_v20 = vadd.f32 %v1734_v19, %v1562_v26  ;;  %v1091_v22 = vpop.f32.mrb[19].mxu0  ;;  %v1105_v27 = vadd.f32 %v1097_v14, %v2075_v8  ;;  %v1183_v8 = vld [vmem:[%s2334_s4 + $0x8] sm:$0xff] }
 0xa2f   :  { %v1092_v24 = vadd.f32 %v1562_v26, %v1091_v22  ;;  %v1103_v36 = vadd.f32 %v1089_v17, %v2071_v5  ;;  %v1108_v5 = vsel %vm1107_vm11, 0.0625, %v1904_v33 }
 0xa30   :  { %v1106_v34 = vadd.f32 %v1100_v20, %v2081_v12  ;;  %v1794_v12 = vpack.c.bf16 %v1183_v8, %v1182_v41  ;;  %v1424_v41 = vld [vmem:[%s2334_s4 + $0x78] sm:$0xff]  ;;  %v1425_v8 = vld [vmem:[%s2334_s4 + $0x80] sm:$0xff] }
 0xa31   :  { %v1104_v38 = vadd.f32 %v1092_v24, %v2077_v9  ;;  %v1184_v9 = vld [vmem:[%s2334_s4 + $0x10] sm:$0xff] }
 0xa32   :  { %v1791_v39 = vpack.c.bf16 %v1106_v34, %v1105_v27  ;;  %v1797_v60 = vpack.c.bf16 %v1185_v56, %v1184_v9 }
 0xa33   :  { %v1788_v40 = vpack.c.bf16 %v1104_v38, %v1103_v36  ;;  %v1422_v38 = vld [vmem:[%s2334_s4 + $0x68] sm:$0xff] }
 0xa35   :  { %1789 = vmatpush3.bf16.msra.mxu1 %v1788_v40 }
 0xa36   :  { %1790 = vmatprep.subr.bf16.mxu1 %v1902_v23 }
 0xa39   :  { %1792 = vmatpush3.bf16.msra.mxu1 %v1791_v39  ;;  %v1423_v39 = vld [vmem:[%s2334_s4 + $0x70] sm:$0xff] }
 0xa3a   :  { %1793 = vmatprep.subr.bf16.mxu1 %v1902_v23  ;;  %v1812_v40 = vpack.c.bf16 %v1423_v39, %v1422_v38 }
 0xa3c   :  { %1744 = vmatmul.mubr.msk.f32.vlgmr.msra.gmra.mrb[16].mxu1 %vm129_vm1, %v1108_v5  ;;  %1813 = vmatpush3.bf16.msra.mxu0 %v1812_v40  ;;  %v1815_v5 = vpack.c.bf16 %v1425_v8, %v1424_v41 }
 0xa3d   :  { %1795 = vmatpush3.bf16.msra.mxu1 %v1794_v12  ;;  %1754 = vmatprep.mubr.msk.f32.mxu1 %vm1903_vm10, %v1904_v33  ;;  %v1574_v12 = vld [vmem:[%s2334_s4 + $0x21] ss:$0 sm:$0xff] }
 0xa3e   :  { %1796 = vmatprep.subr.bf16.mxu1 %v1902_v23  ;;  %1814 = vmatprep.subr.bf16.mxu0 %v1902_v23 }
 0xa40   :  { %1816 = vmatpush3.bf16.msra.mxu0 %v1815_v5 }
 0xa41   :  { %1798 = vmatpush3.bf16.msra.mxu1 %v1797_v60 }
 0xa42   :  { %1799 = vmatprep.subr.bf16.mxu1 %v1902_v23 }
 0xb0f   :  { %v2269_v42 = vpop.f32.mrb[16].mxu1 }
 0xb10   :  { %v1745_v43 = vpop.f32.mrb[17].mxu1  ;;  %1755 = vmatmul.mubr.msk.f32.vlgmr.msra.gmra.mrb[18].mxu1 %vm129_vm1, %v2269_v42 }
 0xb11   :  { %1773 = vmatprep.mubr.msk.f32.mxu1 %vm1903_vm10, %v1904_v33  ;;  %1801 = vmatpush3.bf16.msra.mxu1 %v1800_v30 }
 0xb12   :  { %1802 = vmatprep.subr.bf16.mxu1 %v1902_v23 }
 0xb15   :  { %1804 = vmatpush3.bf16.msra.mxu1 %v1803_v51 }
 0xb16   :  { %1805 = vmatprep.subr.bf16.mxu1 %v1902_v23 }
 0xb19   :  { %1807 = vmatpush3.bf16.msra.mxu1 %v1806_v35 }
 0xb1a   :  { %1808 = vmatprep.subr.bf16.mxu1 %v1902_v23 }
 0xb1d   :  { %1810 = vmatpush3.bf16.msra.mxu1 %v1809_v37 }
 0xbe3   :  { %v1260_v58 = vpop.f32.mrb[18].mxu1 }
 0xbe4   :  { %v1261_v59 = vadd.f32 %v1572_v57, %v1260_v58  ;;  %v1756_v61 = vpop.f32.mrb[19].mxu1 }
 0xbe6   :  { %v1265_v62 = vmul.f32 0.70710677, %v1261_v59  ;;  %v1264_v27 = vmul.f32 0.5, %v1261_v59 }
 0xbe8   :  { %v1266_v63 = vand.u32 2147483647, %v1265_v62  ;;  %vm1295_vm12 = vcmp.ge.f32.partialorder %v1265_v62, 0.0 }
 0xbea   :  { %v1267_v0 = vmul.f32 0.5, %v1266_v63  ;;  %v1288_v31 = vsub.f32 0.0, %v1266_v63 }
 0xbec   :  { %v1268_v1 = vadd.f32 1.0, %v1267_v0  ;;  %v1289_v29 = vmul.f32 %v1288_v31, %v1266_v63  ;;  %v1504_v31 = vsel %vm129_vm1, %v2269_v42, 0.0 }
 0xbee   :  { %1894 = vrcp.f32 %v1268_v1 }
 0xbf8   :  { %v1895_v44 = vpop.eup %1894 }
 0xbf9   :  { %v1270_v45 = vmul.f32 0.17087276, %v1895_v44 }
 0xbfb   :  { %v1271_v2 = vadd.f32 -0.82215226, %v1270_v45 }
 0xbfd   :  { %v1272_v47 = vmul.f32 %v1895_v44, %v1271_v2 }
 0xbff   :  { %v1273_v3 = vadd.f32 1.4885159, %v1272_v47 }
 0xc01   :  { %v1274_v49 = vmul.f32 %v1895_v44, %v1273_v3 }
 0xc03   :  { %v1275_v4 = vadd.f32 -1.135204, %v1274_v49 }
 0xc05   :  { %v1276_v25 = vmul.f32 %v1895_v44, %v1275_v4 }
 0xc07   :  { %v1277_v6 = vadd.f32 0.27886808, %v1276_v25 }
 0xc09   :  { %v1278_v7 = vmul.f32 %v1895_v44, %v1277_v6 }
 0xc0b   :  { %v1279_v21 = vadd.f32 -0.18628806, %v1278_v7 }
 0xc0d   :  { %v1280_v11 = vmul.f32 %v1895_v44, %v1279_v21 }
 0xc0f   :  { %v1281_v28 = vadd.f32 0.09678418, %v1280_v11 }
 0xc11   :  { %v1282_v10 = vmul.f32 %v1895_v44, %v1281_v28 }
 0xc13   :  { %v1283_v13 = vadd.f32 0.37409195, %v1282_v10  ;;  %v1576_v10 = vld [vmem:[%s2334_s4 + $0x22] ss:$0 sm:$0xff] }
 0xc15   :  { %v1284_v15 = vmul.f32 %v1895_v44, %v1283_v13 }
 0xc17   :  { %v1285_v18 = vadd.f32 1.0000237, %v1284_v15 }
 0xc19   :  { %v1286_v33 = vmul.f32 %v1895_v44, %v1285_v18 }
 0xc1b   :  { %v1287_v26 = vadd.f32 -1.2655122, %v1286_v33 }
 0xc1d   :  { %v1290_v14 = vadd.f32 %v1289_v29, %v1287_v26 }
 0xc1f   :  { %v1291_v16 = vmul.f32 1.442695, %v1290_v14 }
 0xc21   :  { %1896 = vpow2.f32 %v1291_v16 }
 0xc2b   :  { %v1897_v17 = vpop.eup %1896 }
 0xc2c   :  { %v1293_v19 = vmul.f32 %v1897_v17, %v1895_v44 }
 0xc2e   :  { %v1294_v20 = vsub.f32 1.0, %v1293_v19 }
 0xc30   :  { %v1296_v22 = vsub.f32 0.0, %v1294_v20 }
 0xc32   :  { %v1297_v24 = vsel %vm1295_vm12, %v1294_v20, %v1296_v22 }
 0xc33   :  { %v1298_v34 = vadd.f32 1.0, %v1297_v24 }
 0xc35   :  { %v1299_v36 = vmul.f32 %v1298_v34, %v1264_v27 }
 0xc37   :  { %1774 = vmatmul.mubr.msk.f32.vlgmr.msra.gmra.mrb[20].mxu1 %vm71_vm0, %v1299_v36 }
 0xd0a   :  { %v1382_v9 = vpop.f32.mrb[20].mxu1 }
 0xd0b   :  { %v1383_v56 = vadd.f32 %v1574_v12, %v1382_v9  ;;  %v1775_v60 = vpop.f32.mrb[21].mxu1 }
 0xd0d   :  { %v1387_v43 = vmul.f32 0.70710677, %v1383_v56  ;;  %v1386_v21 = vmul.f32 0.5, %v1383_v56 }
 0xd0f   :  { %v1388_v46 = vand.u32 2147483647, %v1387_v43  ;;  %vm1417_vm13 = vcmp.ge.f32.partialorder %v1387_v43, 0.0 }
 0xd11   :  { %v1389_v23 = vmul.f32 0.5, %v1388_v46  ;;  %v1410_v1 = vsub.f32 0.0, %v1388_v46 }
 0xd13   :  { %v1390_v48 = vadd.f32 1.0, %v1389_v23  ;;  %v1411_v2 = vmul.f32 %v1410_v1, %v1388_v46 }
 0xd15   :  { %1898 = vrcp.f32 %v1390_v48 }
 0xd1f   :  { %v1899_v30 = vpop.eup %1898 }
 0xd20   :  { %v1392_v50 = vmul.f32 0.17087276, %v1899_v30 }
 0xd22   :  { %v1393_v32 = vadd.f32 -0.82215226, %v1392_v50 }
 0xd24   :  { %v1394_v51 = vmul.f32 %v1899_v30, %v1393_v32 }
 0xd26   :  { %v1395_v52 = vadd.f32 1.4885159, %v1394_v51 }
 0xd28   :  { %v1396_v53 = vmul.f32 %v1899_v30, %v1395_v52 }
 0xd2a   :  { %v1397_v35 = vadd.f32 -1.135204, %v1396_v53 }
 0xd2c   :  { %v1398_v54 = vmul.f32 %v1899_v30, %v1397_v35 }
 0xd2e   :  { %v1399_v55 = vadd.f32 0.27886808, %v1398_v54 }
 0xd30   :  { %v1400_v37 = vmul.f32 %v1899_v30, %v1399_v55 }
 0xd32   :  { %v1401_v57 = vadd.f32 -0.18628806, %v1400_v37 }
 0xd34   :  { %v1402_v58 = vmul.f32 %v1899_v30, %v1401_v57 }
 0xd36   :  { %v1403_v59 = vadd.f32 0.09678418, %v1402_v58 }
 0xd38   :  { %v1404_v61 = vmul.f32 %v1899_v30, %v1403_v59 }
 0xd3a   :  { %v1405_v62 = vadd.f32 0.37409195, %v1404_v61 }
 0xd3c   :  { %v1406_v63 = vmul.f32 %v1899_v30, %v1405_v62 }
 0xd3e   :  { %v1407_v0 = vadd.f32 1.0000237, %v1406_v63 }
 0xd40   :  { %v1408_v44 = vmul.f32 %v1899_v30, %v1407_v0 }
 0xd42   :  { %v1409_v45 = vadd.f32 -1.2655122, %v1408_v44 }
 0xd44   :  { %v1412_v47 = vadd.f32 %v1411_v2, %v1409_v45 }
 0xd46   :  { %v1413_v3 = vmul.f32 1.442695, %v1412_v47 }
 0xd48   :  { %1900 = vpow2.f32 %v1413_v3 }
 0xd52   :  { %v1901_v49 = vpop.eup %1900 }
 0xd53   :  { %v1415_v4 = vmul.f32 %v1901_v49, %v1899_v30 }
 0xd55   :  { %v1416_v25 = vsub.f32 1.0, %v1415_v4 }
 0xd57   :  { %v1418_v6 = vsub.f32 0.0, %v1416_v25 }
 0xd59   :  { %v1419_v7 = vsel %vm1417_vm13, %v1416_v25, %v1418_v6 }
 0xd5a   :  { %v1420_v11 = vadd.f32 1.0, %v1419_v7 }
 0xd5c   :  { %v1421_v28 = vmul.f32 %v1420_v11, %v1386_v21 }
 0xd5e   :  { %1785 = vmatmul.mubr.msk.f32.vlgmr.msra.gmra.mrb[20].mxu0 %vm129_vm1, %v1421_v28 }
 0xe31   :  { %v1500_v13 = vpop.f32.mrb[20].mxu0 }
 0xe32   :  { %v1501_v15 = vadd.f32 %v1576_v10, %v1500_v13  ;;  %v1786_v18 = vpop.f32.mrb[21].mxu0 }
 0xe34   :  { %v1507_v33 = vcombine.low %v1501_v15, %v1504_v31 }
 0xe36   :  { %1578 = vst.sshfl [vmem:[%s2335_s5] sm:$0x33 pattern:$0x76325410] %v1507_v33 }

</bundles_post_ra>
